<compile_context>
chip_gen: v7x
topology: tpu7x:2x2x1
jax: 0.10.0
libtpu: 0.0.40
codegen_flags: <defaults>
</compile_context>

<pallas_src>
import functools

import jax
import jax.numpy as jnp
from jax.experimental import pallas as pl
from jax.experimental.pallas import tpu as pltpu

LATENT_DIM = 128
HALF = LATENT_DIM // 2
EPS = 1e-5
MAX_Z = 16  # synthetic atomic-number vocabulary


# ----------------------------------------------------------------------------
# Fused Pallas kernel: the entire GeomEncoder forward
# ----------------------------------------------------------------------------
def _geom_encoder_kernel(
    # data
    coords_ref, z_col_ref, batch_col_ref, batch_row_ref, lat_ref,
    # encoderGlobal / encoderGeoStruct proxy params
    atom_emb_ref,
    pos_w_ref, pos_b_ref,
    sph_hid_w_ref, sph_hid_b_ref,
    sph_out_w_ref, sph_out_b_ref,
    sph_node_w_ref, sph_node_b_ref,
    # encoderCoordsLatent
    cl_w1_ref, cl_b1_ref, cl_w2_ref, cl_b2_ref,
    # encoderLattice
    lat_w1_ref, lat_b1_ref, lat_w2_ref, lat_b2_ref,
    # combineSemantic
    comb_w_ref, comb_b_ref,
    # GPS proxy (residual MLP)
    gps_w1_ref, gps_b1_ref, gps_w2_ref, gps_b2_ref,
    # proj
    proj_w_ref, proj_b_ref,
    # GraphNorm
    gn_w_ref, gn_b_ref, gn_a_ref,
    # outputs
    sem_out_ref, geo_out_ref,
    # scratch
    cat_ref,
    *, n, b,
):
    f32 = jnp.float32
    bf16 = jnp.bfloat16

    coords = coords_ref[...]                 # [N, 3]  f32
    z_col = z_col_ref[...]                   # [N, 1]  int32
    batch_col = batch_col_ref[...]           # [N, 1]  int32
    batch_row = batch_row_ref[...]           # [1, N]  int32

    # ---- per-graph mean-pool matrix built in-kernel (no onehot / onehot_t /
    #      inv_counts inputs; no lane-sparse (B,1) VMEM blocks) ---------------
    oh_t = (jax.lax.broadcasted_iota(jnp.int32, (b, n), 0)
            == batch_row).astype(f32)                                    # [B, N]
    counts = jnp.sum(oh_t, axis=1, keepdims=True)                        # [B, 1]
    oh_t_mean = oh_t * (1.0 / jnp.maximum(counts, 1.0))                  # [B, N]

    def seg_mean(x):                      # [N, D] -> [B, D]   (one MXU push, K = N)
        return jnp.dot(oh_t_mean, x, preferred_element_type=f32)

    def scatter_g2n(g):                   # [B, D] -> [N, D]   (B VPU FMAs; keeps K=B off the MXU)
        acc = (batch_col == 0).astype(f32) * g[0:1, :]
        for gi in range(1, b):
            acc = acc + (batch_col == gi).astype(f32) * g[gi:gi + 1, :]
        return acc

    def fma_mm(x, w, bias, relu=False):   # tiny-K matmul on the VPU (K = w.shape[0])
        acc = x[:, 0:1] * w[0:1, :]
        for ki in range(1, w.shape[0]):
            acc = acc + x[:, ki:ki + 1] * w[ki:ki + 1, :]
        acc = acc + bias
        return jnp.maximum(acc, 0.0) if relu else acc

    def mm(x, w, bias=None, relu=False):  # MXU matmul: bf16 inputs, f32 accumulation
        acc = jnp.dot(x.astype(bf16), w, preferred_element_type=f32)
        if bias is not None:
            acc = acc + bias
        return jnp.maximum(acc, 0.0) if relu else acc

    # GraphNorm params hoisted once (no per-call reloads inside graphnorm()).
    gn_w, gn_b, gn_a = gn_w_ref[...], gn_b_ref[...], gn_a_ref[...]

    def graphnorm(x):                     # PyG GraphNorm semantics, all stats in f32
        centered = x - scatter_g2n(seg_mean(x)) * gn_a
        var_n = scatter_g2n(seg_mean(centered * centered))
        return gn_w * centered * jax.lax.rsqrt(var_n + EPS) + gn_b

    # ---- encoderGlobal / encoderGeoStruct proxy -----------------------------
    # TODO(synk): SphereNet / SphereNetNode (spherical-harmonic distance/angle/
    # torsion message passing over edge_index) has no clean Pallas equivalent;
    # proxied by atom-embedding (one-hot matmul) + position MLP + mean pooling.
    z_oh = (jax.lax.broadcasted_iota(jnp.int32, (n, MAX_Z), 1)
            == z_col).astype(f32)                                        # [N, 16]
    atom_emb = jnp.dot(z_oh, atom_emb_ref[...], preferred_element_type=f32)   # [N, 128]
    node_h = fma_mm(coords, pos_w_ref[...], pos_b_ref[...], relu=True) + atom_emb
    node_h = mm(node_h, sph_hid_w_ref[...], sph_hid_b_ref[...], relu=True)    # [N, 128]
    graph_h = seg_mean(node_h)                                                # [B, 128]
    graph_latent = mm(graph_h, sph_out_w_ref[...], sph_out_b_ref[...])        # [B, 64]
    geo_node_latent = mm(node_h, sph_node_w_ref[...], sph_node_b_ref[...])    # [N, 64]

    # ---- encoderLattice (K=6 on VPU, K=32 as a single MXU push) -------------
    lat_h = fma_mm(lat_ref[...], lat_w1_ref[...], lat_b1_ref[...], relu=True)  # [B, 32]
    lattice_latent = (jnp.dot(lat_h, lat_w2_ref[...], preferred_element_type=f32)
                      + lat_b2_ref[...])                                       # [B, 64]

    # ---- combineSemantic: split-row matmul == concat([graph, lattice]) @ W --
    sem = (jnp.dot(graph_latent.astype(bf16), comb_w_ref[0:HALF, :],
                   preferred_element_type=f32)
           + jnp.dot(lattice_latent.astype(bf16), comb_w_ref[HALF:LATENT_DIM, :],
                     preferred_element_type=f32)
           + comb_b_ref[...])
    sem_out_ref[...] = sem                                                     # [B, 128]

    # ---- encoderCoordsLatent -------------------------------------------------
    c_h = fma_mm(coords, cl_w1_ref[...], cl_b1_ref[...], relu=True)            # [N, 64]
    coords_latent = mm(c_h, cl_w2_ref[...], cl_b2_ref[...])                    # [N, 64]

    # lane-dense [N, 128] concat kept in a VMEM scratch tile (no HBM round trip)
    cat_ref[:, 0:HALF] = coords_latent
    cat_ref[:, HALF:LATENT_DIM] = geo_node_latent
    geo = cat_ref[...]

    # ---- GraphNorm -> encoderCoords proxy -> GraphNorm -> proj ---------------
    # TODO(synk): GPSModel (4-layer graph transformer: local MP over edge_index
    # + global multihead attention) not reproducible here; proxied by a residual
    # 2-layer MLP over node features.
    geo = graphnorm(geo)
    h = mm(geo, gps_w1_ref[...], gps_b1_ref[...], relu=True)
    geo = geo + mm(h, gps_w2_ref[...], gps_b2_ref[...])
    geo = graphnorm(geo)
    geo_out_ref[...] = mm(geo, proj_w_ref[...], proj_b_ref[...])               # [N, 128]


# ----------------------------------------------------------------------------
# Parameter init (deterministic, synthetic)
# ----------------------------------------------------------------------------
def init_params(key, latent_dim=LATENT_DIM):
    half = latent_dim // 2
    ks = iter(jax.random.split(key, 32))
    bf16 = jnp.bfloat16  # MXU-native weight dtype; accumulation stays f32 in-kernel

    def lin(kk, fan_in, fan_out, dtype=jnp.float32):
        w = (jax.random.normal(kk, (fan_in, fan_out), jnp.float32) * 0.05).astype(dtype)
        return w, jnp.zeros((fan_out,), jnp.float32)

    p = {}
    # SphereNet / SphereNetNode stand-in parameters
    p["atom_emb"] = jax.random.normal(next(ks), (MAX_Z, latent_dim), jnp.float32) * 0.05
    p["pos_w"], p["pos_b"] = lin(next(ks), 3, latent_dim)
    p["sph_hid_w"], p["sph_hid_b"] = lin(next(ks), latent_dim, latent_dim, bf16)
    p["sph_out_w"], p["sph_out_b"] = lin(next(ks), latent_dim, half, bf16)     # graph latent
    p["sph_node_w"], p["sph_node_b"] = lin(next(ks), latent_dim, half, bf16)   # node latent
    # encoderCoordsLatent: Linear(3, 64) -> ReLU -> Linear(64, latent_dim//2)
    p["cl_w1"], p["cl_b1"] = lin(next(ks), 3, 64)
    p["cl_w2"], p["cl_b2"] = lin(next(ks), 64, half, bf16)
    # encoderLattice: Linear(6, 32) -> ReLU -> Linear(32, latent_dim//2)
    p["lat_w1"], p["lat_b1"] = lin(next(ks), 6, 32)
    p["lat_w2"], p["lat_b2"] = lin(next(ks), 32, half)
    # combineSemantic (is_condition=False): Linear(latent_dim, latent_dim)
    p["comb_w"], p["comb_b"] = lin(next(ks), latent_dim, latent_dim, bf16)
    # GPSModel stand-in (latent_dim -> latent_dim)
    p["gps_w1"], p["gps_b1"] = lin(next(ks), latent_dim, latent_dim, bf16)
    p["gps_w2"], p["gps_b2"] = lin(next(ks), latent_dim, latent_dim, bf16)
    # proj: Linear(latent_dim, latent_dim)
    p["proj_w"], p["proj_b"] = lin(next(ks), latent_dim, latent_dim, bf16)
    # GraphNorm(latent_dim): weight=1, bias=0, mean_scale=1 (PyG default init)
    p["gn_w"] = jnp.ones((latent_dim,), jnp.float32)
    p["gn_b"] = jnp.zeros((latent_dim,), jnp.float32)
    p["gn_a"] = jnp.ones((latent_dim,), jnp.float32)
    return p


# ----------------------------------------------------------------------------
# GeomEncoder forward: one fused pallas_call
# ----------------------------------------------------------------------------
def geom_encoder_forward(params, z, coords, edge_index, batch,
                         lengths_normed, angles_normed, num_atoms, *, num_graphs):
    del edge_index           # consumed only by the SphereNet / GPS proxies (see TODOs)
    _ = num_atoms.max()      # max_batch_num_node (computed but unused, as in torch)

    n = coords.shape[0]
    b = num_graphs
    d = LATENT_DIM

    # tiny input prep (shape plumbing only; no intermediate HBM round trips)
    lat = jnp.concatenate([lengths_normed, angles_normed], axis=-1).astype(jnp.float32)  # [B, 6]
    z_col = z.astype(jnp.int32).reshape(n, 1)
    batch_col = batch.astype(jnp.int32).reshape(n, 1)
    batch_row = batch.astype(jnp.int32).reshape(1, n)

    def row(v):  # biases / per-feature params as lane rows (1, M)
        return v.reshape(1, -1)

    inputs = [
        coords.astype(jnp.float32), z_col, batch_col, batch_row, lat,
        params["atom_emb"],
        params["pos_w"], row(params["pos_b"]),
        params["sph_hid_w"], row(params["sph_hid_b"]),
        params["sph_out_w"], row(params["sph_out_b"]),
        params["sph_node_w"], row(params["sph_node_b"]),
        params["cl_w1"], row(params["cl_b1"]),
        params["cl_w2"], row(params["cl_b2"]),
        params["lat_w1"], row(params["lat_b1"]),
        params["lat_w2"], row(params["lat_b2"]),
        params["comb_w"], row(params["comb_b"]),
        params["gps_w1"], row(params["gps_b1"]),
        params["gps_w2"], row(params["gps_b2"]),
        params["proj_w"], row(params["proj_b"]),
        row(params["gn_w"]), row(params["gn_b"]), row(params["gn_a"]),
    ]

    def full_spec(shape):
        nd = len(shape)
        return pl.BlockSpec(shape, lambda i, _nd=nd: (0,) * _nd)

    sem, geo = pl.pallas_call(
        functools.partial(_geom_encoder_kernel, n=n, b=b),
        out_shape=(jax.ShapeDtypeStruct((b, d), jnp.float32),
                   jax.ShapeDtypeStruct((n, d), jnp.float32)),
        # single fused invocation — launch/DMA overhead paid exactly once.
        # TODO(synk): if N scales up, add a leading "parallel" node-tile grid
        # axis so megacore (v7x 2-TC) sharding kicks in.
        grid=(1,),
        in_specs=[full_spec(x.shape) for x in inputs],
        out_specs=(full_spec((b, d)), full_spec((n, d))),
        scratch_shapes=[pltpu.VMEM((n, d), jnp.float32)],
        compiler_params=pltpu.CompilerParams(dimension_semantics=("arbitrary",)),
    )(*inputs)
    return sem, geo


# ----------------------------------------------------------------------------
# Driver
# ----------------------------------------------------------------------------
if __name__ == "__main__":
    key = jax.random.PRNGKey(0)
    k_params, k_pos, k_len, k_ang = jax.random.split(key, 4)

    num_graphs = 2
    nodes_per_graph = 4
    n_nodes = num_graphs * nodes_per_graph            # 8 nodes total

    z = jnp.array([1, 6, 8, 1, 6, 7, 8, 1], dtype=jnp.int32)          # [8]
    coords = jax.random.uniform(k_pos, (n_nodes, 3), jnp.float32)     # [8, 3]
    batch = jnp.array([0, 0, 0, 0, 1, 1, 1, 1], dtype=jnp.int32)      # [8]
    lengths_normed = jax.random.uniform(k_len, (num_graphs, 3), jnp.float32)
    angles_normed = jax.random.uniform(k_ang, (num_graphs, 3), jnp.float32)
    num_atoms = jnp.array([nodes_per_graph, nodes_per_graph], dtype=jnp.int32)
    # fully-connected intra-graph edges (unused by the proxies; kept for signature parity)
    src = jnp.array([i for g in range(num_graphs) for i in range(g * 4, g * 4 + 4)
                     for _ in range(3)], dtype=jnp.int32)
    dst = jnp.array([j for g in range(num_graphs) for i in range(g * 4, g * 4 + 4)
                     for j in range(g * 4, g * 4 + 4) if j != i], dtype=jnp.int32)
    edge_index = jnp.stack([src, dst], axis=0)

    params = init_params(k_params, LATENT_DIM)

    fwd = jax.jit(functools.partial(geom_encoder_forward, num_graphs=num_graphs))
    semantic_latent, geo_coords_latent = fwd(
        params, z, coords, edge_index, batch, lengths_normed, angles_normed, num_atoms)
    jax.block_until_ready((semantic_latent, geo_coords_latent))

    assert semantic_latent.shape == (num_graphs, LATENT_DIM)
    assert geo_coords_latent.shape == (n_nodes, LATENT_DIM)
    assert jnp.all(jnp.isfinite(semantic_latent)) and jnp.all(jnp.isfinite(geo_coords_latent))
    print("KERNEL_OK")
</pallas_src>

<mosaic_0001>
module attributes {stable_mosaic.version = 11 : i64} {
  func.func @_geom_encoder_kernel(%arg0: i32, %arg1: memref<8x3xf32, #tpu.memory_space<vmem>>, %arg2: memref<8x1xi32, #tpu.memory_space<vmem>>, %arg3: memref<8x1xi32, #tpu.memory_space<vmem>>, %arg4: memref<1x8xi32, #tpu.memory_space<vmem>>, %arg5: memref<2x6xf32, #tpu.memory_space<vmem>>, %arg6: memref<16x128xf32, #tpu.memory_space<vmem>>, %arg7: memref<3x128xf32, #tpu.memory_space<vmem>>, %arg8: memref<1x128xf32, #tpu.memory_space<vmem>>, %arg9: memref<128x128xbf16, #tpu.memory_space<vmem>>, %arg10: memref<1x128xf32, #tpu.memory_space<vmem>>, %arg11: memref<128x64xbf16, #tpu.memory_space<vmem>>, %arg12: memref<1x64xf32, #tpu.memory_space<vmem>>, %arg13: memref<128x64xbf16, #tpu.memory_space<vmem>>, %arg14: memref<1x64xf32, #tpu.memory_space<vmem>>, %arg15: memref<3x64xf32, #tpu.memory_space<vmem>>, %arg16: memref<1x64xf32, #tpu.memory_space<vmem>>, %arg17: memref<64x64xbf16, #tpu.memory_space<vmem>>, %arg18: memref<1x64xf32, #tpu.memory_space<vmem>>, %arg19: memref<6x32xf32, #tpu.memory_space<vmem>>, %arg20: memref<1x32xf32, #tpu.memory_space<vmem>>, %arg21: memref<32x64xf32, #tpu.memory_space<vmem>>, %arg22: memref<1x64xf32, #tpu.memory_space<vmem>>, %arg23: memref<128x128xbf16, #tpu.memory_space<vmem>>, %arg24: memref<1x128xf32, #tpu.memory_space<vmem>>, %arg25: memref<128x128xbf16, #tpu.memory_space<vmem>>, %arg26: memref<1x128xf32, #tpu.memory_space<vmem>>, %arg27: memref<128x128xbf16, #tpu.memory_space<vmem>>, %arg28: memref<1x128xf32, #tpu.memory_space<vmem>>, %arg29: memref<128x128xbf16, #tpu.memory_space<vmem>>, %arg30: memref<1x128xf32, #tpu.memory_space<vmem>>, %arg31: memref<1x128xf32, #tpu.memory_space<vmem>>, %arg32: memref<1x128xf32, #tpu.memory_space<vmem>>, %arg33: memref<1x128xf32, #tpu.memory_space<vmem>>, %arg34: memref<2x128xf32, #tpu.memory_space<vmem>>, %arg35: memref<8x128xf32, #tpu.memory_space<vmem>>, %arg36: memref<8x128xf32, #tpu.memory_space<vmem>>) attributes {dimension_semantics = [#tpu.dimension_semantics<arbitrary>], iteration_bounds = array<i64: 1>, scalar_prefetch = 0 : i64, scratch_operands = 1 : i64, tpu.core_type = #tpu.core_type<tc>, window_params = [{pipeline_mode = #tpu.pipeline_mode<synchronous>, transform_indices = @transform_0, window_bounds = array<i64: 8, 3>}, {pipeline_mode = #tpu.pipeline_mode<synchronous>, transform_indices = @transform_1, window_bounds = array<i64: 8, 1>}, {pipeline_mode = #tpu.pipeline_mode<synchronous>, transform_indices = @transform_2, window_bounds = array<i64: 8, 1>}, {pipeline_mode = #tpu.pipeline_mode<synchronous>, transform_indices = @transform_3, window_bounds = array<i64: 1, 8>}, {pipeline_mode = #tpu.pipeline_mode<synchronous>, transform_indices = @transform_4, window_bounds = array<i64: 2, 6>}, {pipeline_mode = #tpu.pipeline_mode<synchronous>, transform_indices = @transform_5, window_bounds = array<i64: 16, 128>}, {pipeline_mode = #tpu.pipeline_mode<synchronous>, transform_indices = @transform_6, window_bounds = array<i64: 3, 128>}, {pipeline_mode = #tpu.pipeline_mode<synchronous>, transform_indices = @transform_7, window_bounds = array<i64: 1, 128>}, {pipeline_mode = #tpu.pipeline_mode<synchronous>, transform_indices = @transform_8, window_bounds = array<i64: 128, 128>}, {pipeline_mode = #tpu.pipeline_mode<synchronous>, transform_indices = @transform_9, window_bounds = array<i64: 1, 128>}, {pipeline_mode = #tpu.pipeline_mode<synchronous>, transform_indices = @transform_10, window_bounds = array<i64: 128, 64>}, {pipeline_mode = #tpu.pipeline_mode<synchronous>, transform_indices = @transform_11, window_bounds = array<i64: 1, 64>}, {pipeline_mode = #tpu.pipeline_mode<synchronous>, transform_indices = @transform_12, window_bounds = array<i64: 128, 64>}, {pipeline_mode = #tpu.pipeline_mode<synchronous>, transform_indices = @transform_13, window_bounds = array<i64: 1, 64>}, {pipeline_mode = #tpu.pipeline_mode<synchronous>, transform_indices = @transform_14, window_bounds = array<i64: 3, 64>}, {pipeline_mode = #tpu.pipeline_mode<synchronous>, transform_indices = @transform_15, window_bounds = array<i64: 1, 64>}, {pipeline_mode = #tpu.pipeline_mode<synchronous>, transform_indices = @transform_16, window_bounds = array<i64: 64, 64>}, {pipeline_mode = #tpu.pipeline_mode<synchronous>, transform_indices = @transform_17, window_bounds = array<i64: 1, 64>}, {pipeline_mode = #tpu.pipeline_mode<synchronous>, transform_indices = @transform_18, window_bounds = array<i64: 6, 32>}, {pipeline_mode = #tpu.pipeline_mode<synchronous>, transform_indices = @transform_19, window_bounds = array<i64: 1, 32>}, {pipeline_mode = #tpu.pipeline_mode<synchronous>, transform_indices = @transform_20, window_bounds = array<i64: 32, 64>}, {pipeline_mode = #tpu.pipeline_mode<synchronous>, transform_indices = @transform_21, window_bounds = array<i64: 1, 64>}, {pipeline_mode = #tpu.pipeline_mode<synchronous>, transform_indices = @transform_22, window_bounds = array<i64: 128, 128>}, {pipeline_mode = #tpu.pipeline_mode<synchronous>, transform_indices = @transform_23, window_bounds = array<i64: 1, 128>}, {pipeline_mode = #tpu.pipeline_mode<synchronous>, transform_indices = @transform_24, window_bounds = array<i64: 128, 128>}, {pipeline_mode = #tpu.pipeline_mode<synchronous>, transform_indices = @transform_25, window_bounds = array<i64: 1, 128>}, {pipeline_mode = #tpu.pipeline_mode<synchronous>, transform_indices = @transform_26, window_bounds = array<i64: 128, 128>}, {pipeline_mode = #tpu.pipeline_mode<synchronous>, transform_indices = @transform_27, window_bounds = array<i64: 1, 128>}, {pipeline_mode = #tpu.pipeline_mode<synchronous>, transform_indices = @transform_28, window_bounds = array<i64: 128, 128>}, {pipeline_mode = #tpu.pipeline_mode<synchronous>, transform_indices = @transform_29, window_bounds = array<i64: 1, 128>}, {pipeline_mode = #tpu.pipeline_mode<synchronous>, transform_indices = @transform_30, window_bounds = array<i64: 1, 128>}, {pipeline_mode = #tpu.pipeline_mode<synchronous>, transform_indices = @transform_31, window_bounds = array<i64: 1, 128>}, {pipeline_mode = #tpu.pipeline_mode<synchronous>, transform_indices = @transform_32, window_bounds = array<i64: 1, 128>}, {pipeline_mode = #tpu.pipeline_mode<synchronous>, transform_indices = @transform_33, window_bounds = array<i64: 2, 128>}, {pipeline_mode = #tpu.pipeline_mode<synchronous>, transform_indices = @transform_34, window_bounds = array<i64: 8, 128>}]} {
    %c0 = arith.constant 0 : index
    %c0_0 = arith.constant 0 : index
    %0 = vector.load %arg1[%c0, %c0_0] : memref<8x3xf32, #tpu.memory_space<vmem>>, vector<8x3xf32>
    %c0_1 = arith.constant 0 : index
    %c0_2 = arith.constant 0 : index
    %1 = vector.load %arg2[%c0_1, %c0_2] : memref<8x1xi32, #tpu.memory_space<vmem>>, vector<8x1xi32>
    %c0_3 = arith.constant 0 : index
    %c0_4 = arith.constant 0 : index
    %2 = vector.load %arg3[%c0_3, %c0_4] : memref<8x1xi32, #tpu.memory_space<vmem>>, vector<8x1xi32>
    %c0_5 = arith.constant 0 : index
    %c0_6 = arith.constant 0 : index
    %3 = vector.load %arg4[%c0_5, %c0_6] : memref<1x8xi32, #tpu.memory_space<vmem>>, vector<1x8xi32>
    %4 = tpu.iota {dimensions = array<i32: 0>} : vector<2x8xi32>
    %5 = vector.broadcast %3 : vector<1x8xi32> to vector<2x8xi32>
    %6 = arith.cmpi eq, %4, %5 : vector<2x8xi32>
    %7 = arith.extui %6 : vector<2x8xi1> to vector<2x8xi32>
    %8 = arith.sitofp %7 : vector<2x8xi32> to vector<2x8xf32>
    %cst = arith.constant dense<0.000000e+00> : vector<2xf32>
    %9 = vector.multi_reduction <add>, %8, %cst [1] : vector<2x8xf32> to vector<2xf32>
    %10 = vector.shape_cast %9 : vector<2xf32> to vector<2x1xf32>
    %cst_7 = arith.constant 1.000000e+00 : f32
    %11 = vector.broadcast %cst_7 : f32 to vector<2x1xf32>
    %12 = arith.maximumf %10, %11 : vector<2x1xf32>
    %cst_8 = arith.constant 1.000000e+00 : f32
    %13 = vector.broadcast %cst_8 : f32 to vector<2x1xf32>
    %14 = arith.divf %13, %12 : vector<2x1xf32>
    %15 = vector.broadcast %14 : vector<2x1xf32> to vector<2x8xf32>
    %16 = arith.mulf %8, %15 : vector<2x8xf32>
    %c0_9 = arith.constant 0 : index
    %c0_10 = arith.constant 0 : index
    %17 = vector.load %arg31[%c0_9, %c0_10] : memref<1x128xf32, #tpu.memory_space<vmem>>, vector<1x128xf32>
    %c0_11 = arith.constant 0 : index
    %c0_12 = arith.constant 0 : index
    %18 = vector.load %arg32[%c0_11, %c0_12] : memref<1x128xf32, #tpu.memory_space<vmem>>, vector<1x128xf32>
    %c0_13 = arith.constant 0 : index
    %c0_14 = arith.constant 0 : index
    %19 = vector.load %arg33[%c0_13, %c0_14] : memref<1x128xf32, #tpu.memory_space<vmem>>, vector<1x128xf32>
    %20 = tpu.iota {dimensions = array<i32: 1>} : vector<8x16xi32>
    %21 = vector.broadcast %1 : vector<8x1xi32> to vector<8x16xi32>
    %22 = arith.cmpi eq, %20, %21 : vector<8x16xi32>
    %23 = arith.extui %22 : vector<8x16xi1> to vector<8x16xi32>
    %24 = arith.sitofp %23 : vector<8x16xi32> to vector<8x16xf32>
    %c0_15 = arith.constant 0 : index
    %c0_16 = arith.constant 0 : index
    %25 = vector.load %arg6[%c0_15, %c0_16] : memref<16x128xf32, #tpu.memory_space<vmem>>, vector<16x128xf32>
    %cst_17 = arith.constant dense<0.000000e+00> : vector<8x128xf32>
    %26 = tpu.matmul %24, %25, %cst_17 {dimension_numbers = #tpu.dot_dimension_numbers<[1], [0], [0], [1], [0, 0, 1, 1], [], []>} : vector<8x16xf32>, vector<16x128xf32>, vector<8x128xf32> -> vector<8x128xf32>
    %c0_18 = arith.constant 0 : index
    %c0_19 = arith.constant 0 : index
    %27 = vector.load %arg7[%c0_18, %c0_19] : memref<3x128xf32, #tpu.memory_space<vmem>>, vector<3x128xf32>
    %c0_20 = arith.constant 0 : index
    %c0_21 = arith.constant 0 : index
    %28 = vector.load %arg8[%c0_20, %c0_21] : memref<1x128xf32, #tpu.memory_space<vmem>>, vector<1x128xf32>
    %29 = vector.extract_strided_slice %0 {offsets = [0, 0], sizes = [8, 1], strides = [1, 1]} : vector<8x3xf32> to vector<8x1xf32>
    %30 = vector.extract_strided_slice %27 {offsets = [0, 0], sizes = [1, 128], strides = [1, 1]} : vector<3x128xf32> to vector<1x128xf32>
    %31 = vector.broadcast %29 : vector<8x1xf32> to vector<8x128xf32>
    %32 = vector.broadcast %30 : vector<1x128xf32> to vector<8x128xf32>
    %33 = arith.mulf %31, %32 : vector<8x128xf32>
    %34 = vector.extract_strided_slice %0 {offsets = [0, 1], sizes = [8, 1], strides = [1, 1]} : vector<8x3xf32> to vector<8x1xf32>
    %35 = vector.extract_strided_slice %27 {offsets = [1, 0], sizes = [1, 128], strides = [1, 1]} : vector<3x128xf32> to vector<1x128xf32>
    %36 = vector.broadcast %34 : vector<8x1xf32> to vector<8x128xf32>
    %37 = vector.broadcast %35 : vector<1x128xf32> to vector<8x128xf32>
    %38 = arith.mulf %36, %37 : vector<8x128xf32>
    %39 = arith.addf %33, %38 : vector<8x128xf32>
    %40 = vector.extract_strided_slice %0 {offsets = [0, 2], sizes = [8, 1], strides = [1, 1]} : vector<8x3xf32> to vector<8x1xf32>
    %41 = vector.extract_strided_slice %27 {offsets = [2, 0], sizes = [1, 128], strides = [1, 1]} : vector<3x128xf32> to vector<1x128xf32>
    %42 = vector.broadcast %40 : vector<8x1xf32> to vector<8x128xf32>
    %43 = vector.broadcast %41 : vector<1x128xf32> to vector<8x128xf32>
    %44 = arith.mulf %42, %43 : vector<8x128xf32>
    %45 = arith.addf %39, %44 : vector<8x128xf32>
    %46 = vector.broadcast %28 : vector<1x128xf32> to vector<8x128xf32>
    %47 = arith.addf %45, %46 : vector<8x128xf32>
    %cst_22 = arith.constant 0.000000e+00 : f32
    %48 = vector.broadcast %cst_22 : f32 to vector<8x128xf32>
    %49 = arith.maximumf %47, %48 : vector<8x128xf32>
    %50 = arith.addf %49, %26 : vector<8x128xf32>
    %c0_23 = arith.constant 0 : index
    %c0_24 = arith.constant 0 : index
    %51 = vector.load %arg9[%c0_23, %c0_24] : memref<128x128xbf16, #tpu.memory_space<vmem>>, vector<128x128xbf16>
    %c0_25 = arith.constant 0 : index
    %c0_26 = arith.constant 0 : index
    %52 = vector.load %arg10[%c0_25, %c0_26] : memref<1x128xf32, #tpu.memory_space<vmem>>, vector<1x128xf32>
    %53 = arith.truncf %50 : vector<8x128xf32> to vector<8x128xbf16>
    %cst_27 = arith.constant dense<0.000000e+00> : vector<8x128xf32>
    %54 = tpu.matmul %53, %51, %cst_27 {dimension_numbers = #tpu.dot_dimension_numbers<[1], [0], [0], [1], [0, 0, 1, 1], [], []>} : vector<8x128xbf16>, vector<128x128xbf16>, vector<8x128xf32> -> vector<8x128xf32>
    %55 = vector.broadcast %52 : vector<1x128xf32> to vector<8x128xf32>
    %56 = arith.addf %54, %55 : vector<8x128xf32>
    %cst_28 = arith.constant 0.000000e+00 : f32
    %57 = vector.broadcast %cst_28 : f32 to vector<8x128xf32>
    %58 = arith.maximumf %56, %57 : vector<8x128xf32>
    %cst_29 = arith.constant dense<0.000000e+00> : vector<2x128xf32>
    %59 = tpu.matmul %16, %58, %cst_29 {dimension_numbers = #tpu.dot_dimension_numbers<[1], [0], [0], [1], [0, 0, 1, 1], [], []>} : vector<2x8xf32>, vector<8x128xf32>, vector<2x128xf32> -> vector<2x128xf32>
    %c0_30 = arith.constant 0 : index
    %c0_31 = arith.constant 0 : index
    %60 = vector.load %arg11[%c0_30, %c0_31] : memref<128x64xbf16, #tpu.memory_space<vmem>>, vector<128x64xbf16>
    %c0_32 = arith.constant 0 : index
    %c0_33 = arith.constant 0 : index
    %61 = vector.load %arg12[%c0_32, %c0_33] : memref<1x64xf32, #tpu.memory_space<vmem>>, vector<1x64xf32>
    %62 = arith.truncf %59 : vector<2x128xf32> to vector<2x128xbf16>
    %cst_34 = arith.constant dense<0.000000e+00> : vector<2x64xf32>
    %63 = tpu.matmul %62, %60, %cst_34 {dimension_numbers = #tpu.dot_dimension_numbers<[1], [0], [0], [1], [0, 0, 1, 1], [], []>} : vector<2x128xbf16>, vector<128x64xbf16>, vector<2x64xf32> -> vector<2x64xf32>
    %64 = vector.broadcast %61 : vector<1x64xf32> to vector<2x64xf32>
    %65 = arith.addf %63, %64 : vector<2x64xf32>
    %c0_35 = arith.constant 0 : index
    %c0_36 = arith.constant 0 : index
    %66 = vector.load %arg13[%c0_35, %c0_36] : memref<128x64xbf16, #tpu.memory_space<vmem>>, vector<128x64xbf16>
    %c0_37 = arith.constant 0 : index
    %c0_38 = arith.constant 0 : index
    %67 = vector.load %arg14[%c0_37, %c0_38] : memref<1x64xf32, #tpu.memory_space<vmem>>, vector<1x64xf32>
    %68 = arith.truncf %58 : vector<8x128xf32> to vector<8x128xbf16>
    %cst_39 = arith.constant dense<0.000000e+00> : vector<8x64xf32>
    %69 = tpu.matmul %68, %66, %cst_39 {dimension_numbers = #tpu.dot_dimension_numbers<[1], [0], [0], [1], [0, 0, 1, 1], [], []>} : vector<8x128xbf16>, vector<128x64xbf16>, vector<8x64xf32> -> vector<8x64xf32>
    %70 = vector.broadcast %67 : vector<1x64xf32> to vector<8x64xf32>
    %71 = arith.addf %69, %70 : vector<8x64xf32>
    %c0_40 = arith.constant 0 : index
    %c0_41 = arith.constant 0 : index
    %72 = vector.load %arg5[%c0_40, %c0_41] : memref<2x6xf32, #tpu.memory_space<vmem>>, vector<2x6xf32>
    %c0_42 = arith.constant 0 : index
    %c0_43 = arith.constant 0 : index
    %73 = vector.load %arg19[%c0_42, %c0_43] : memref<6x32xf32, #tpu.memory_space<vmem>>, vector<6x32xf32>
    %c0_44 = arith.constant 0 : index
    %c0_45 = arith.constant 0 : index
    %74 = vector.load %arg20[%c0_44, %c0_45] : memref<1x32xf32, #tpu.memory_space<vmem>>, vector<1x32xf32>
    %75 = vector.extract_strided_slice %72 {offsets = [0, 0], sizes = [2, 1], strides = [1, 1]} : vector<2x6xf32> to vector<2x1xf32>
    %76 = vector.extract_strided_slice %73 {offsets = [0, 0], sizes = [1, 32], strides = [1, 1]} : vector<6x32xf32> to vector<1x32xf32>
    %77 = vector.broadcast %75 : vector<2x1xf32> to vector<2x32xf32>
    %78 = vector.broadcast %76 : vector<1x32xf32> to vector<2x32xf32>
    %79 = arith.mulf %77, %78 : vector<2x32xf32>
    %80 = vector.extract_strided_slice %72 {offsets = [0, 1], sizes = [2, 1], strides = [1, 1]} : vector<2x6xf32> to vector<2x1xf32>
    %81 = vector.extract_strided_slice %73 {offsets = [1, 0], sizes = [1, 32], strides = [1, 1]} : vector<6x32xf32> to vector<1x32xf32>
    %82 = vector.broadcast %80 : vector<2x1xf32> to vector<2x32xf32>
    %83 = vector.broadcast %81 : vector<1x32xf32> to vector<2x32xf32>
    %84 = arith.mulf %82, %83 : vector<2x32xf32>
    %85 = arith.addf %79, %84 : vector<2x32xf32>
    %86 = vector.extract_strided_slice %72 {offsets = [0, 2], sizes = [2, 1], strides = [1, 1]} : vector<2x6xf32> to vector<2x1xf32>
    %87 = vector.extract_strided_slice %73 {offsets = [2, 0], sizes = [1, 32], strides = [1, 1]} : vector<6x32xf32> to vector<1x32xf32>
    %88 = vector.broadcast %86 : vector<2x1xf32> to vector<2x32xf32>
    %89 = vector.broadcast %87 : vector<1x32xf32> to vector<2x32xf32>
    %90 = arith.mulf %88, %89 : vector<2x32xf32>
    %91 = arith.addf %85, %90 : vector<2x32xf32>
    %92 = vector.extract_strided_slice %72 {offsets = [0, 3], sizes = [2, 1], strides = [1, 1]} : vector<2x6xf32> to vector<2x1xf32>
    %93 = vector.extract_strided_slice %73 {offsets = [3, 0], sizes = [1, 32], strides = [1, 1]} : vector<6x32xf32> to vector<1x32xf32>
    %94 = vector.broadcast %92 : vector<2x1xf32> to vector<2x32xf32>
    %95 = vector.broadcast %93 : vector<1x32xf32> to vector<2x32xf32>
    %96 = arith.mulf %94, %95 : vector<2x32xf32>
    %97 = arith.addf %91, %96 : vector<2x32xf32>
    %98 = vector.extract_strided_slice %72 {offsets = [0, 4], sizes = [2, 1], strides = [1, 1]} : vector<2x6xf32> to vector<2x1xf32>
    %99 = vector.extract_strided_slice %73 {offsets = [4, 0], sizes = [1, 32], strides = [1, 1]} : vector<6x32xf32> to vector<1x32xf32>
    %100 = vector.broadcast %98 : vector<2x1xf32> to vector<2x32xf32>
    %101 = vector.broadcast %99 : vector<1x32xf32> to vector<2x32xf32>
    %102 = arith.mulf %100, %101 : vector<2x32xf32>
    %103 = arith.addf %97, %102 : vector<2x32xf32>
    %104 = vector.extract_strided_slice %72 {offsets = [0, 5], sizes = [2, 1], strides = [1, 1]} : vector<2x6xf32> to vector<2x1xf32>
    %105 = vector.extract_strided_slice %73 {offsets = [5, 0], sizes = [1, 32], strides = [1, 1]} : vector<6x32xf32> to vector<1x32xf32>
    %106 = vector.broadcast %104 : vector<2x1xf32> to vector<2x32xf32>
    %107 = vector.broadcast %105 : vector<1x32xf32> to vector<2x32xf32>
    %108 = arith.mulf %106, %107 : vector<2x32xf32>
    %109 = arith.addf %103, %108 : vector<2x32xf32>
    %110 = vector.broadcast %74 : vector<1x32xf32> to vector<2x32xf32>
    %111 = arith.addf %109, %110 : vector<2x32xf32>
    %cst_46 = arith.constant 0.000000e+00 : f32
    %112 = vector.broadcast %cst_46 : f32 to vector<2x32xf32>
    %113 = arith.maximumf %111, %112 : vector<2x32xf32>
    %c0_47 = arith.constant 0 : index
    %c0_48 = arith.constant 0 : index
    %114 = vector.load %arg21[%c0_47, %c0_48] : memref<32x64xf32, #tpu.memory_space<vmem>>, vector<32x64xf32>
    %cst_49 = arith.constant dense<0.000000e+00> : vector<2x64xf32>
    %115 = tpu.matmul %113, %114, %cst_49 {dimension_numbers = #tpu.dot_dimension_numbers<[1], [0], [0], [1], [0, 0, 1, 1], [], []>} : vector<2x32xf32>, vector<32x64xf32>, vector<2x64xf32> -> vector<2x64xf32>
    %c0_50 = arith.constant 0 : index
    %c0_51 = arith.constant 0 : index
    %116 = vector.load %arg22[%c0_50, %c0_51] : memref<1x64xf32, #tpu.memory_space<vmem>>, vector<1x64xf32>
    %117 = vector.broadcast %116 : vector<1x64xf32> to vector<2x64xf32>
    %118 = arith.addf %115, %117 : vector<2x64xf32>
    %119 = arith.truncf %65 : vector<2x64xf32> to vector<2x64xbf16>
    %c0_52 = arith.constant 0 : index
    %c0_53 = arith.constant 0 : index
    %120 = vector.load %arg23[%c0_52, %c0_53] : memref<128x128xbf16, #tpu.memory_space<vmem>>, vector<64x128xbf16>
    %cst_54 = arith.constant dense<0.000000e+00> : vector<2x128xf32>
    %121 = tpu.matmul %119, %120, %cst_54 {dimension_numbers = #tpu.dot_dimension_numbers<[1], [0], [0], [1], [0, 0, 1, 1], [], []>} : vector<2x64xbf16>, vector<64x128xbf16>, vector<2x128xf32> -> vector<2x128xf32>
    %122 = arith.truncf %118 : vector<2x64xf32> to vector<2x64xbf16>
    %c64 = arith.constant 64 : index
    %c0_55 = arith.constant 0 : index
    %123 = vector.load %arg23[%c64, %c0_55] : memref<128x128xbf16, #tpu.memory_space<vmem>>, vector<64x128xbf16>
    %cst_56 = arith.constant dense<0.000000e+00> : vector<2x128xf32>
    %124 = tpu.matmul %122, %123, %cst_56 {dimension_numbers = #tpu.dot_dimension_numbers<[1], [0], [0], [1], [0, 0, 1, 1], [], []>} : vector<2x64xbf16>, vector<64x128xbf16>, vector<2x128xf32> -> vector<2x128xf32>
    %125 = arith.addf %121, %124 : vector<2x128xf32>
    %c0_57 = arith.constant 0 : index
    %c0_58 = arith.constant 0 : index
    %126 = vector.load %arg24[%c0_57, %c0_58] : memref<1x128xf32, #tpu.memory_space<vmem>>, vector<1x128xf32>
    %127 = vector.broadcast %126 : vector<1x128xf32> to vector<2x128xf32>
    %128 = arith.addf %125, %127 : vector<2x128xf32>
    %c0_59 = arith.constant 0 : index
    %c0_60 = arith.constant 0 : index
    %129 = vector.load %arg34[%c0_59, %c0_60] : memref<2x128xf32, #tpu.memory_space<vmem>>, vector<2x128xf32>
    tpu.vector_store %arg34[%c0_59, %c0_60], %128 {strides = array<i32>} : memref<2x128xf32, #tpu.memory_space<vmem>>, vector<2x128xf32>,
    %c0_61 = arith.constant 0 : index
    %c0_62 = arith.constant 0 : index
    %130 = vector.load %arg15[%c0_61, %c0_62] : memref<3x64xf32, #tpu.memory_space<vmem>>, vector<3x64xf32>
    %c0_63 = arith.constant 0 : index
    %c0_64 = arith.constant 0 : index
    %131 = vector.load %arg16[%c0_63, %c0_64] : memref<1x64xf32, #tpu.memory_space<vmem>>, vector<1x64xf32>
    %132 = vector.extract_strided_slice %0 {offsets = [0, 0], sizes = [8, 1], strides = [1, 1]} : vector<8x3xf32> to vector<8x1xf32>
    %133 = vector.extract_strided_slice %130 {offsets = [0, 0], sizes = [1, 64], strides = [1, 1]} : vector<3x64xf32> to vector<1x64xf32>
    %134 = vector.broadcast %132 : vector<8x1xf32> to vector<8x64xf32>
    %135 = vector.broadcast %133 : vector<1x64xf32> to vector<8x64xf32>
    %136 = arith.mulf %134, %135 : vector<8x64xf32>
    %137 = vector.extract_strided_slice %0 {offsets = [0, 1], sizes = [8, 1], strides = [1, 1]} : vector<8x3xf32> to vector<8x1xf32>
    %138 = vector.extract_strided_slice %130 {offsets = [1, 0], sizes = [1, 64], strides = [1, 1]} : vector<3x64xf32> to vector<1x64xf32>
    %139 = vector.broadcast %137 : vector<8x1xf32> to vector<8x64xf32>
    %140 = vector.broadcast %138 : vector<1x64xf32> to vector<8x64xf32>
    %141 = arith.mulf %139, %140 : vector<8x64xf32>
    %142 = arith.addf %136, %141 : vector<8x64xf32>
    %143 = vector.extract_strided_slice %0 {offsets = [0, 2], sizes = [8, 1], strides = [1, 1]} : vector<8x3xf32> to vector<8x1xf32>
    %144 = vector.extract_strided_slice %130 {offsets = [2, 0], sizes = [1, 64], strides = [1, 1]} : vector<3x64xf32> to vector<1x64xf32>
    %145 = vector.broadcast %143 : vector<8x1xf32> to vector<8x64xf32>
    %146 = vector.broadcast %144 : vector<1x64xf32> to vector<8x64xf32>
    %147 = arith.mulf %145, %146 : vector<8x64xf32>
    %148 = arith.addf %142, %147 : vector<8x64xf32>
    %149 = vector.broadcast %131 : vector<1x64xf32> to vector<8x64xf32>
    %150 = arith.addf %148, %149 : vector<8x64xf32>
    %cst_65 = arith.constant 0.000000e+00 : f32
    %151 = vector.broadcast %cst_65 : f32 to vector<8x64xf32>
    %152 = arith.maximumf %150, %151 : vector<8x64xf32>
    %c0_66 = arith.constant 0 : index
    %c0_67 = arith.constant 0 : index
    %153 = vector.load %arg17[%c0_66, %c0_67] : memref<64x64xbf16, #tpu.memory_space<vmem>>, vector<64x64xbf16>
    %c0_68 = arith.constant 0 : index
    %c0_69 = arith.constant 0 : index
    %154 = vector.load %arg18[%c0_68, %c0_69] : memref<1x64xf32, #tpu.memory_space<vmem>>, vector<1x64xf32>
    %155 = arith.truncf %152 : vector<8x64xf32> to vector<8x64xbf16>
    %cst_70 = arith.constant dense<0.000000e+00> : vector<8x64xf32>
    %156 = tpu.matmul %155, %153, %cst_70 {dimension_numbers = #tpu.dot_dimension_numbers<[1], [0], [0], [1], [0, 0, 1, 1], [], []>} : vector<8x64xbf16>, vector<64x64xbf16>, vector<8x64xf32> -> vector<8x64xf32>
    %157 = vector.broadcast %154 : vector<1x64xf32> to vector<8x64xf32>
    %158 = arith.addf %156, %157 : vector<8x64xf32>
    %c0_71 = arith.constant 0 : index
    %c0_72 = arith.constant 0 : index
    %159 = vector.load %arg36[%c0_71, %c0_72] : memref<8x128xf32, #tpu.memory_space<vmem>>, vector<8x64xf32>
    tpu.vector_store %arg36[%c0_71, %c0_72], %158 {strides = array<i32>} : memref<8x128xf32, #tpu.memory_space<vmem>>, vector<8x64xf32>,
    %c0_73 = arith.constant 0 : index
    %c64_74 = arith.constant 64 : index
    %160 = vector.load %arg36[%c0_73, %c64_74] : memref<8x128xf32, #tpu.memory_space<vmem>>, vector<8x64xf32>
    tpu.vector_store %arg36[%c0_73, %c64_74], %71 {strides = array<i32>} : memref<8x128xf32, #tpu.memory_space<vmem>>, vector<8x64xf32>,
    %c0_75 = arith.constant 0 : index
    %c0_76 = arith.constant 0 : index
    %161 = vector.load %arg36[%c0_75, %c0_76] : memref<8x128xf32, #tpu.memory_space<vmem>>, vector<8x128xf32>
    %cst_77 = arith.constant dense<0.000000e+00> : vector<2x128xf32>
    %162 = tpu.matmul %16, %161, %cst_77 {dimension_numbers = #tpu.dot_dimension_numbers<[1], [0], [0], [1], [0, 0, 1, 1], [], []>} : vector<2x8xf32>, vector<8x128xf32>, vector<2x128xf32> -> vector<2x128xf32>
    %c0_i32 = arith.constant 0 : i32
    %163 = vector.broadcast %c0_i32 : i32 to vector<8x1xi32>
    %164 = arith.cmpi eq, %2, %163 : vector<8x1xi32>
    %165 = arith.extui %164 : vector<8x1xi1> to vector<8x1xi32>
    %166 = arith.sitofp %165 : vector<8x1xi32> to vector<8x1xf32>
    %167 = vector.extract_strided_slice %162 {offsets = [0, 0], sizes = [1, 128], strides = [1, 1]} : vector<2x128xf32> to vector<1x128xf32>
    %168 = vector.broadcast %166 : vector<8x1xf32> to vector<8x128xf32>
    %169 = vector.broadcast %167 : vector<1x128xf32> to vector<8x128xf32>
    %170 = arith.mulf %168, %169 : vector<8x128xf32>
    %c1_i32 = arith.constant 1 : i32
    %171 = vector.broadcast %c1_i32 : i32 to vector<8x1xi32>
    %172 = arith.cmpi eq, %2, %171 : vector<8x1xi32>
    %173 = arith.extui %172 : vector<8x1xi1> to vector<8x1xi32>
    %174 = arith.sitofp %173 : vector<8x1xi32> to vector<8x1xf32>
    %175 = vector.extract_strided_slice %162 {offsets = [1, 0], sizes = [1, 128], strides = [1, 1]} : vector<2x128xf32> to vector<1x128xf32>
    %176 = vector.broadcast %174 : vector<8x1xf32> to vector<8x128xf32>
    %177 = vector.broadcast %175 : vector<1x128xf32> to vector<8x128xf32>
    %178 = arith.mulf %176, %177 : vector<8x128xf32>
    %179 = arith.addf %170, %178 : vector<8x128xf32>
    %180 = vector.broadcast %19 : vector<1x128xf32> to vector<8x128xf32>
    %181 = arith.mulf %179, %180 : vector<8x128xf32>
    %182 = arith.subf %161, %181 : vector<8x128xf32>
    %183 = arith.mulf %182, %182 : vector<8x128xf32>
    %cst_78 = arith.constant dense<0.000000e+00> : vector<2x128xf32>
    %184 = tpu.matmul %16, %183, %cst_78 {dimension_numbers = #tpu.dot_dimension_numbers<[1], [0], [0], [1], [0, 0, 1, 1], [], []>} : vector<2x8xf32>, vector<8x128xf32>, vector<2x128xf32> -> vector<2x128xf32>
    %c0_i32_79 = arith.constant 0 : i32
    %185 = vector.broadcast %c0_i32_79 : i32 to vector<8x1xi32>
    %186 = arith.cmpi eq, %2, %185 : vector<8x1xi32>
    %187 = arith.extui %186 : vector<8x1xi1> to vector<8x1xi32>
    %188 = arith.sitofp %187 : vector<8x1xi32> to vector<8x1xf32>
    %189 = vector.extract_strided_slice %184 {offsets = [0, 0], sizes = [1, 128], strides = [1, 1]} : vector<2x128xf32> to vector<1x128xf32>
    %190 = vector.broadcast %188 : vector<8x1xf32> to vector<8x128xf32>
    %191 = vector.broadcast %189 : vector<1x128xf32> to vector<8x128xf32>
    %192 = arith.mulf %190, %191 : vector<8x128xf32>
    %c1_i32_80 = arith.constant 1 : i32
    %193 = vector.broadcast %c1_i32_80 : i32 to vector<8x1xi32>
    %194 = arith.cmpi eq, %2, %193 : vector<8x1xi32>
    %195 = arith.extui %194 : vector<8x1xi1> to vector<8x1xi32>
    %196 = arith.sitofp %195 : vector<8x1xi32> to vector<8x1xf32>
    %197 = vector.extract_strided_slice %184 {offsets = [1, 0], sizes = [1, 128], strides = [1, 1]} : vector<2x128xf32> to vector<1x128xf32>
    %198 = vector.broadcast %196 : vector<8x1xf32> to vector<8x128xf32>
    %199 = vector.broadcast %197 : vector<1x128xf32> to vector<8x128xf32>
    %200 = arith.mulf %198, %199 : vector<8x128xf32>
    %201 = arith.addf %192, %200 : vector<8x128xf32>
    %202 = vector.broadcast %17 : vector<1x128xf32> to vector<8x128xf32>
    %203 = arith.mulf %202, %182 : vector<8x128xf32>
    %cst_81 = arith.constant 9.99999974E-6 : f32
    %204 = vector.broadcast %cst_81 : f32 to vector<8x128xf32>
    %205 = arith.addf %201, %204 : vector<8x128xf32>
    %206 = math.rsqrt %205 : vector<8x128xf32>
    %207 = arith.mulf %203, %206 : vector<8x128xf32>
    %208 = vector.broadcast %18 : vector<1x128xf32> to vector<8x128xf32>
    %209 = arith.addf %207, %208 : vector<8x128xf32>
    %c0_82 = arith.constant 0 : index
    %c0_83 = arith.constant 0 : index
    %210 = vector.load %arg25[%c0_82, %c0_83] : memref<128x128xbf16, #tpu.memory_space<vmem>>, vector<128x128xbf16>
    %c0_84 = arith.constant 0 : index
    %c0_85 = arith.constant 0 : index
    %211 = vector.load %arg26[%c0_84, %c0_85] : memref<1x128xf32, #tpu.memory_space<vmem>>, vector<1x128xf32>
    %212 = arith.truncf %209 : vector<8x128xf32> to vector<8x128xbf16>
    %cst_86 = arith.constant dense<0.000000e+00> : vector<8x128xf32>
    %213 = tpu.matmul %212, %210, %cst_86 {dimension_numbers = #tpu.dot_dimension_numbers<[1], [0], [0], [1], [0, 0, 1, 1], [], []>} : vector<8x128xbf16>, vector<128x128xbf16>, vector<8x128xf32> -> vector<8x128xf32>
    %214 = vector.broadcast %211 : vector<1x128xf32> to vector<8x128xf32>
    %215 = arith.addf %213, %214 : vector<8x128xf32>
    %cst_87 = arith.constant 0.000000e+00 : f32
    %216 = vector.broadcast %cst_87 : f32 to vector<8x128xf32>
    %217 = arith.maximumf %215, %216 : vector<8x128xf32>
    %c0_88 = arith.constant 0 : index
    %c0_89 = arith.constant 0 : index
    %218 = vector.load %arg27[%c0_88, %c0_89] : memref<128x128xbf16, #tpu.memory_space<vmem>>, vector<128x128xbf16>
    %c0_90 = arith.constant 0 : index
    %c0_91 = arith.constant 0 : index
    %219 = vector.load %arg28[%c0_90, %c0_91] : memref<1x128xf32, #tpu.memory_space<vmem>>, vector<1x128xf32>
    %220 = arith.truncf %217 : vector<8x128xf32> to vector<8x128xbf16>
    %cst_92 = arith.constant dense<0.000000e+00> : vector<8x128xf32>
    %221 = tpu.matmul %220, %218, %cst_92 {dimension_numbers = #tpu.dot_dimension_numbers<[1], [0], [0], [1], [0, 0, 1, 1], [], []>} : vector<8x128xbf16>, vector<128x128xbf16>, vector<8x128xf32> -> vector<8x128xf32>
    %222 = vector.broadcast %219 : vector<1x128xf32> to vector<8x128xf32>
    %223 = arith.addf %221, %222 : vector<8x128xf32>
    %224 = arith.addf %209, %223 : vector<8x128xf32>
    %cst_93 = arith.constant dense<0.000000e+00> : vector<2x128xf32>
    %225 = tpu.matmul %16, %224, %cst_93 {dimension_numbers = #tpu.dot_dimension_numbers<[1], [0], [0], [1], [0, 0, 1, 1], [], []>} : vector<2x8xf32>, vector<8x128xf32>, vector<2x128xf32> -> vector<2x128xf32>
    %c0_i32_94 = arith.constant 0 : i32
    %226 = vector.broadcast %c0_i32_94 : i32 to vector<8x1xi32>
    %227 = arith.cmpi eq, %2, %226 : vector<8x1xi32>
    %228 = arith.extui %227 : vector<8x1xi1> to vector<8x1xi32>
    %229 = arith.sitofp %228 : vector<8x1xi32> to vector<8x1xf32>
    %230 = vector.extract_strided_slice %225 {offsets = [0, 0], sizes = [1, 128], strides = [1, 1]} : vector<2x128xf32> to vector<1x128xf32>
    %231 = vector.broadcast %229 : vector<8x1xf32> to vector<8x128xf32>
    %232 = vector.broadcast %230 : vector<1x128xf32> to vector<8x128xf32>
    %233 = arith.mulf %231, %232 : vector<8x128xf32>
    %c1_i32_95 = arith.constant 1 : i32
    %234 = vector.broadcast %c1_i32_95 : i32 to vector<8x1xi32>
    %235 = arith.cmpi eq, %2, %234 : vector<8x1xi32>
    %236 = arith.extui %235 : vector<8x1xi1> to vector<8x1xi32>
    %237 = arith.sitofp %236 : vector<8x1xi32> to vector<8x1xf32>
    %238 = vector.extract_strided_slice %225 {offsets = [1, 0], sizes = [1, 128], strides = [1, 1]} : vector<2x128xf32> to vector<1x128xf32>
    %239 = vector.broadcast %237 : vector<8x1xf32> to vector<8x128xf32>
    %240 = vector.broadcast %238 : vector<1x128xf32> to vector<8x128xf32>
    %241 = arith.mulf %239, %240 : vector<8x128xf32>
    %242 = arith.addf %233, %241 : vector<8x128xf32>
    %243 = vector.broadcast %19 : vector<1x128xf32> to vector<8x128xf32>
    %244 = arith.mulf %242, %243 : vector<8x128xf32>
    %245 = arith.subf %224, %244 : vector<8x128xf32>
    %246 = arith.mulf %245, %245 : vector<8x128xf32>
    %cst_96 = arith.constant dense<0.000000e+00> : vector<2x128xf32>
    %247 = tpu.matmul %16, %246, %cst_96 {dimension_numbers = #tpu.dot_dimension_numbers<[1], [0], [0], [1], [0, 0, 1, 1], [], []>} : vector<2x8xf32>, vector<8x128xf32>, vector<2x128xf32> -> vector<2x128xf32>
    %c0_i32_97 = arith.constant 0 : i32
    %248 = vector.broadcast %c0_i32_97 : i32 to vector<8x1xi32>
    %249 = arith.cmpi eq, %2, %248 : vector<8x1xi32>
    %250 = arith.extui %249 : vector<8x1xi1> to vector<8x1xi32>
    %251 = arith.sitofp %250 : vector<8x1xi32> to vector<8x1xf32>
    %252 = vector.extract_strided_slice %247 {offsets = [0, 0], sizes = [1, 128], strides = [1, 1]} : vector<2x128xf32> to vector<1x128xf32>
    %253 = vector.broadcast %251 : vector<8x1xf32> to vector<8x128xf32>
    %254 = vector.broadcast %252 : vector<1x128xf32> to vector<8x128xf32>
    %255 = arith.mulf %253, %254 : vector<8x128xf32>
    %c1_i32_98 = arith.constant 1 : i32
    %256 = vector.broadcast %c1_i32_98 : i32 to vector<8x1xi32>
    %257 = arith.cmpi eq, %2, %256 : vector<8x1xi32>
    %258 = arith.extui %257 : vector<8x1xi1> to vector<8x1xi32>
    %259 = arith.sitofp %258 : vector<8x1xi32> to vector<8x1xf32>
    %260 = vector.extract_strided_slice %247 {offsets = [1, 0], sizes = [1, 128], strides = [1, 1]} : vector<2x128xf32> to vector<1x128xf32>
    %261 = vector.broadcast %259 : vector<8x1xf32> to vector<8x128xf32>
    %262 = vector.broadcast %260 : vector<1x128xf32> to vector<8x128xf32>
    %263 = arith.mulf %261, %262 : vector<8x128xf32>
    %264 = arith.addf %255, %263 : vector<8x128xf32>
    %265 = vector.broadcast %17 : vector<1x128xf32> to vector<8x128xf32>
    %266 = arith.mulf %265, %245 : vector<8x128xf32>
    %cst_99 = arith.constant 9.99999974E-6 : f32
    %267 = vector.broadcast %cst_99 : f32 to vector<8x128xf32>
    %268 = arith.addf %264, %267 : vector<8x128xf32>
    %269 = math.rsqrt %268 : vector<8x128xf32>
    %270 = arith.mulf %266, %269 : vector<8x128xf32>
    %271 = vector.broadcast %18 : vector<1x128xf32> to vector<8x128xf32>
    %272 = arith.addf %270, %271 : vector<8x128xf32>
    %c0_100 = arith.constant 0 : index
    %c0_101 = arith.constant 0 : index
    %273 = vector.load %arg29[%c0_100, %c0_101] : memref<128x128xbf16, #tpu.memory_space<vmem>>, vector<128x128xbf16>
    %c0_102 = arith.constant 0 : index
    %c0_103 = arith.constant 0 : index
    %274 = vector.load %arg30[%c0_102, %c0_103] : memref<1x128xf32, #tpu.memory_space<vmem>>, vector<1x128xf32>
    %275 = arith.truncf %272 : vector<8x128xf32> to vector<8x128xbf16>
    %cst_104 = arith.constant dense<0.000000e+00> : vector<8x128xf32>
    %276 = tpu.matmul %275, %273, %cst_104 {dimension_numbers = #tpu.dot_dimension_numbers<[1], [0], [0], [1], [0, 0, 1, 1], [], []>} : vector<8x128xbf16>, vector<128x128xbf16>, vector<8x128xf32> -> vector<8x128xf32>
    %277 = vector.broadcast %274 : vector<1x128xf32> to vector<8x128xf32>
    %278 = arith.addf %276, %277 : vector<8x128xf32>
    %c0_105 = arith.constant 0 : index
    %c0_106 = arith.constant 0 : index
    %279 = vector.load %arg35[%c0_105, %c0_106] : memref<8x128xf32, #tpu.memory_space<vmem>>, vector<8x128xf32>
    tpu.vector_store %arg35[%c0_105, %c0_106], %278 {strides = array<i32>} : memref<8x128xf32, #tpu.memory_space<vmem>>, vector<8x128xf32>,
    return
  }
  func.func @transform_0(%arg0: i32) -> (i32, i32) {
    %c0_i32 = arith.constant 0 : i32
    %c0_i32_0 = arith.constant 0 : i32
    %c0_i32_1 = arith.constant 0 : i32
    return %c0_i32, %c0_i32_0 : i32, i32
  }
  func.func @transform_1(%arg0: i32) -> (i32, i32) {
    %c0_i32 = arith.constant 0 : i32
    %c0_i32_0 = arith.constant 0 : i32
    %c0_i32_1 = arith.constant 0 : i32
    return %c0_i32, %c0_i32_0 : i32, i32
  }
  func.func @transform_2(%arg0: i32) -> (i32, i32) {
    %c0_i32 = arith.constant 0 : i32
    %c0_i32_0 = arith.constant 0 : i32
    %c0_i32_1 = arith.constant 0 : i32
    return %c0_i32, %c0_i32_0 : i32, i32
  }
  func.func @transform_3(%arg0: i32) -> (i32, i32) {
    %c0_i32 = arith.constant 0 : i32
    %c0_i32_0 = arith.constant 0 : i32
    %c0_i32_1 = arith.constant 0 : i32
    return %c0_i32, %c0_i32_0 : i32, i32
  }
  func.func @transform_4(%arg0: i32) -> (i32, i32) {
    %c0_i32 = arith.constant 0 : i32
    %c0_i32_0 = arith.constant 0 : i32
    %c0_i32_1 = arith.constant 0 : i32
    return %c0_i32, %c0_i32_0 : i32, i32
  }
  func.func @transform_5(%arg0: i32) -> (i32, i32) {
    %c0_i32 = arith.constant 0 : i32
    %c0_i32_0 = arith.constant 0 : i32
    %c0_i32_1 = arith.constant 0 : i32
    return %c0_i32, %c0_i32_0 : i32, i32
  }
  func.func @transform_6(%arg0: i32) -> (i32, i32) {
    %c0_i32 = arith.constant 0 : i32
    %c0_i32_0 = arith.constant 0 : i32
    %c0_i32_1 = arith.constant 0 : i32
    return %c0_i32, %c0_i32_0 : i32, i32
  }
  func.func @transform_7(%arg0: i32) -> (i32, i32) {
    %c0_i32 = arith.constant 0 : i32
    %c0_i32_0 = arith.constant 0 : i32
    %c0_i32_1 = arith.constant 0 : i32
    return %c0_i32, %c0_i32_0 : i32, i32
  }
  func.func @transform_8(%arg0: i32) -> (i32, i32) {
    %c0_i32 = arith.constant 0 : i32
    %c0_i32_0 = arith.constant 0 : i32
    %c0_i32_1 = arith.constant 0 : i32
    return %c0_i32, %c0_i32_0 : i32, i32
  }
  func.func @transform_9(%arg0: i32) -> (i32, i32) {
    %c0_i32 = arith.constant 0 : i32
    %c0_i32_0 = arith.constant 0 : i32
    %c0_i32_1 = arith.constant 0 : i32
    return %c0_i32, %c0_i32_0 : i32, i32
  }
  func.func @transform_10(%arg0: i32) -> (i32, i32) {
    %c0_i32 = arith.constant 0 : i32
    %c0_i32_0 = arith.constant 0 : i32
    %c0_i32_1 = arith.constant 0 : i32
    return %c0_i32, %c0_i32_0 : i32, i32
  }
  func.func @transform_11(%arg0: i32) -> (i32, i32) {
    %c0_i32 = arith.constant 0 : i32
    %c0_i32_0 = arith.constant 0 : i32
    %c0_i32_1 = arith.constant 0 : i32
    return %c0_i32, %c0_i32_0 : i32, i32
  }
  func.func @transform_12(%arg0: i32) -> (i32, i32) {
    %c0_i32 = arith.constant 0 : i32
    %c0_i32_0 = arith.constant 0 : i32
    %c0_i32_1 = arith.constant 0 : i32
    return %c0_i32, %c0_i32_0 : i32, i32
  }
  func.func @transform_13(%arg0: i32) -> (i32, i32) {
    %c0_i32 = arith.constant 0 : i32
    %c0_i32_0 = arith.constant 0 : i32
    %c0_i32_1 = arith.constant 0 : i32
    return %c0_i32, %c0_i32_0 : i32, i32
  }
  func.func @transform_14(%arg0: i32) -> (i32, i32) {
    %c0_i32 = arith.constant 0 : i32
    %c0_i32_0 = arith.constant 0 : i32
    %c0_i32_1 = arith.constant 0 : i32
    return %c0_i32, %c0_i32_0 : i32, i32
  }
  func.func @transform_15(%arg0: i32) -> (i32, i32) {
    %c0_i32 = arith.constant 0 : i32
    %c0_i32_0 = arith.constant 0 : i32
    %c0_i32_1 = arith.constant 0 : i32
    return %c0_i32, %c0_i32_0 : i32, i32
  }
  func.func @transform_16(%arg0: i32) -> (i32, i32) {
    %c0_i32 = arith.constant 0 : i32
    %c0_i32_0 = arith.constant 0 : i32
    %c0_i32_1 = arith.constant 0 : i32
    return %c0_i32, %c0_i32_0 : i32, i32
  }
  func.func @transform_17(%arg0: i32) -> (i32, i32) {
    %c0_i32 = arith.constant 0 : i32
    %c0_i32_0 = arith.constant 0 : i32
    %c0_i32_1 = arith.constant 0 : i32
    return %c0_i32, %c0_i32_0 : i32, i32
  }
  func.func @transform_18(%arg0: i32) -> (i32, i32) {
    %c0_i32 = arith.constant 0 : i32
    %c0_i32_0 = arith.constant 0 : i32
    %c0_i32_1 = arith.constant 0 : i32
    return %c0_i32, %c0_i32_0 : i32, i32
  }
  func.func @transform_19(%arg0: i32) -> (i32, i32) {
    %c0_i32 = arith.constant 0 : i32
    %c0_i32_0 = arith.constant 0 : i32
    %c0_i32_1 = arith.constant 0 : i32
    return %c0_i32, %c0_i32_0 : i32, i32
  }
  func.func @transform_20(%arg0: i32) -> (i32, i32) {
    %c0_i32 = arith.constant 0 : i32
    %c0_i32_0 = arith.constant 0 : i32
    %c0_i32_1 = arith.constant 0 : i32
    return %c0_i32, %c0_i32_0 : i32, i32
  }
  func.func @transform_21(%arg0: i32) -> (i32, i32) {
    %c0_i32 = arith.constant 0 : i32
    %c0_i32_0 = arith.constant 0 : i32
    %c0_i32_1 = arith.constant 0 : i32
    return %c0_i32, %c0_i32_0 : i32, i32
  }
  func.func @transform_22(%arg0: i32) -> (i32, i32) {
    %c0_i32 = arith.constant 0 : i32
    %c0_i32_0 = arith.constant 0 : i32
    %c0_i32_1 = arith.constant 0 : i32
    return %c0_i32, %c0_i32_0 : i32, i32
  }
  func.func @transform_23(%arg0: i32) -> (i32, i32) {
    %c0_i32 = arith.constant 0 : i32
    %c0_i32_0 = arith.constant 0 : i32
    %c0_i32_1 = arith.constant 0 : i32
    return %c0_i32, %c0_i32_0 : i32, i32
  }
  func.func @transform_24(%arg0: i32) -> (i32, i32) {
    %c0_i32 = arith.constant 0 : i32
    %c0_i32_0 = arith.constant 0 : i32
    %c0_i32_1 = arith.constant 0 : i32
    return %c0_i32, %c0_i32_0 : i32, i32
  }
  func.func @transform_25(%arg0: i32) -> (i32, i32) {
    %c0_i32 = arith.constant 0 : i32
    %c0_i32_0 = arith.constant 0 : i32
    %c0_i32_1 = arith.constant 0 : i32
    return %c0_i32, %c0_i32_0 : i32, i32
  }
  func.func @transform_26(%arg0: i32) -> (i32, i32) {
    %c0_i32 = arith.constant 0 : i32
    %c0_i32_0 = arith.constant 0 : i32
    %c0_i32_1 = arith.constant 0 : i32
    return %c0_i32, %c0_i32_0 : i32, i32
  }
  func.func @transform_27(%arg0: i32) -> (i32, i32) {
    %c0_i32 = arith.constant 0 : i32
    %c0_i32_0 = arith.constant 0 : i32
    %c0_i32_1 = arith.constant 0 : i32
    return %c0_i32, %c0_i32_0 : i32, i32
  }
  func.func @transform_28(%arg0: i32) -> (i32, i32) {
    %c0_i32 = arith.constant 0 : i32
    %c0_i32_0 = arith.constant 0 : i32
    %c0_i32_1 = arith.constant 0 : i32
    return %c0_i32, %c0_i32_0 : i32, i32
  }
  func.func @transform_29(%arg0: i32) -> (i32, i32) {
    %c0_i32 = arith.constant 0 : i32
    %c0_i32_0 = arith.constant 0 : i32
    %c0_i32_1 = arith.constant 0 : i32
    return %c0_i32, %c0_i32_0 : i32, i32
  }
  func.func @transform_30(%arg0: i32) -> (i32, i32) {
    %c0_i32 = arith.constant 0 : i32
    %c0_i32_0 = arith.constant 0 : i32
    %c0_i32_1 = arith.constant 0 : i32
    return %c0_i32, %c0_i32_0 : i32, i32
  }
  func.func @transform_31(%arg0: i32) -> (i32, i32) {
    %c0_i32 = arith.constant 0 : i32
    %c0_i32_0 = arith.constant 0 : i32
    %c0_i32_1 = arith.constant 0 : i32
    return %c0_i32, %c0_i32_0 : i32, i32
  }
  func.func @transform_32(%arg0: i32) -> (i32, i32) {
    %c0_i32 = arith.constant 0 : i32
    %c0_i32_0 = arith.constant 0 : i32
    %c0_i32_1 = arith.constant 0 : i32
    return %c0_i32, %c0_i32_0 : i32, i32
  }
  func.func @transform_33(%arg0: i32) -> (i32, i32) {
    %c0_i32 = arith.constant 0 : i32
    %c0_i32_0 = arith.constant 0 : i32
    %c0_i32_1 = arith.constant 0 : i32
    return %c0_i32, %c0_i32_0 : i32, i32
  }
  func.func @transform_34(%arg0: i32) -> (i32, i32) {
    %c0_i32 = arith.constant 0 : i32
    %c0_i32_0 = arith.constant 0 : i32
    %c0_i32_1 = arith.constant 0 : i32
    return %c0_i32, %c0_i32_0 : i32, i32
  }
}

</mosaic_0001>

<bundles_post_ra>
// kernel: geom_encoder_forward.1
= control target key start
LH: loop header
LB: loop body
LE: loop exit
PB: predicated region body
PF: predicated region fallthrough
CT: control target
= control target key end

     0   :  { %s3208_s6 = smov 1   ;;  %s3209_s10 = smov 2   ;;  %s3822_s0 = inlined_call_operand.smem [shape: u32[35], index: -1, kind: input, shape index: {}] }
   0x1   :  { %s3285_s5 = sld [smem:[%s3822_s0]]   ;;  %s3210_s14 = smov 3  }
   0x2   :  { %s3290_s9 = sld [smem:[%s3822_s0 + %s3208_s6]]   ;;  %s3211_s18 = smov 4  }
   0x3   :  { %s3295_s13 = sld [smem:[%s3822_s0 + %s3209_s10]]   ;;  %s3212_s22 = smov 5  }
   0x4   :  { %s3300_s17 = sld [smem:[%s3822_s0 + %s3210_s14]]   ;;  %s3213_s26 = smov 6  }
   0x5   :  { %s3305_s21 = sld [smem:[%s3822_s0 + %s3211_s18]]   ;;  %s3214_s30 = smov 7  }
   0x6   :  { %s3310_s25 = sld [smem:[%s3822_s0 + %s3212_s22]]   ;;  %s3215_s4 = smov 8  }
   0x7   :  { %3834 = sst [smem:[#allocation51_spill]] %s3285_s5  ;;  %s3216_s10 = smov 9  }
   0x8   :  { %3835 = sst [smem:[#allocation52_spill]] %s3290_s9  ;;  %s3217_s15 = smov 10  }
   0x9   :  { %3836 = sst [smem:[#allocation53_spill]] %s3295_s13  ;;  %s3218_s20 = smov 11  }
   0xa   :  { %3837 = sst [smem:[#allocation54_spill]] %s3300_s17  ;;  %s3220_s1 = smov 13  }
   0xb   :  { %3838 = sst [smem:[#allocation55_spill]] %s3305_s21  ;;  %s3221_s7 = smov 14  }
   0xc   :  { %s3315_s29 = sld [smem:[%s3822_s0 + %s3213_s26]]   ;;  %s3219_s26 = smov 12  }
   0xd   :  { %s3320_s3 = sld [smem:[%s3822_s0 + %s3214_s30]]   ;;  %s3223_s22 = smov 16  }
   0xe   :  { %s3325_s8 = sld [smem:[%s3822_s0 + %s3215_s4]]   ;;  %s3224_s28 = smov 17  }
   0xf   :  { %s3330_s14 = sld [smem:[%s3822_s0 + %s3216_s10]]  }
  0x10   :  { %s3335_s19 = sld [smem:[%s3822_s0 + %s3217_s15]]   ;;  %s3222_s15 = smov 15  }
  0x11   :  { %s3340_s24 = sld [smem:[%s3822_s0 + %s3218_s20]]  }
  0x12   :  { %s3345_s30 = sld [smem:[%s3822_s0 + %s3219_s26]]  }
  0x13   :  { %3839 = sst [smem:[#allocation56_spill]] %s3320_s3 }
  0x14   :  { %3840 = sst [smem:[#allocation57_spill]] %s3325_s8 }
  0x15   :  { %s3350_s6 = sld [smem:[%s3822_s0 + %s3220_s1]]  }
  0x16   :  { %3841 = sst [smem:[#allocation58_spill]] %s3335_s19 }
  0x17   :  { %s3355_s12 = sld [smem:[%s3822_s0 + %s3221_s7]]   ;;  %s3225_s7 = smov 18  }
  0x18   :  { %3842 = sst [smem:[#allocation59_spill]] %s3345_s30 }
  0x19   :  { %s3360_s20 = sld [smem:[%s3822_s0 + %s3222_s15]]   ;;  %s3226_s15 = smov 19  }
  0x1a   :  { %s3365_s27 = sld [smem:[%s3822_s0 + %s3223_s22]]   ;;  %s3227_s22 = smov 20  }
  0x1b   :  { %s3370_s4 = sld [smem:[%s3822_s0 + %s3224_s28]]   ;;  %s3228_s28 = smov 21  }
  0x1c   :  { %s3375_s13 = sld [smem:[%s3822_s0 + %s3225_s7]]   ;;  %s3229_s7 = smov 22  }
  0x1d   :  { %s3380_s19 = sld [smem:[%s3822_s0 + %s3226_s15]]   ;;  %s3230_s15 = smov 23  }
  0x1e   :  { %s3385_s21 = sld [smem:[%s3822_s0 + %s3227_s22]]   ;;  %s3231_s22 = smov 24  }
  0x1f   :  { %s3390_s30 = sld [smem:[%s3822_s0 + %s3228_s28]]   ;;  %s3232_s28 = smov 25  }
  0x20   :  { %s3395_s3 = sld [smem:[%s3822_s0 + %s3229_s7]]   ;;  %s3233_s7 = smov 26  }
  0x21   :  { %s3400_s17 = sld [smem:[%s3822_s0 + %s3230_s15]]   ;;  %s3234_s15 = smov 27  }
  0x22   :  { %s3405_s8 = sld [smem:[%s3822_s0 + %s3231_s22]]   ;;  %s3235_s22 = smov 28  }
  0x23   :  { %3843 = sst [smem:[#allocation60_spill]] %s3380_s19 }
  0x24   :  { %s3410_s5 = sld [smem:[%s3822_s0 + %s3232_s28]]   ;;  %s3236_s28 = smov 29  }
  0x25   :  { %3844 = sst [smem:[#allocation61_spill]] %s3390_s30 }
  0x26   :  { %3845 = sst [smem:[#allocation62_spill]] %s3395_s3 }
  0x27   :  { %s3415_s3 = sld [smem:[%s3822_s0 + %s3233_s7]]   ;;  %s3237_s7 = smov 30  }
  0x28   :  { %3846 = sst [smem:[#allocation63_spill]] %s3405_s8 }
  0x29   :  { %s3420_s9 = sld [smem:[%s3822_s0 + %s3234_s15]]   ;;  %s3238_s15 = smov 31  }
  0x2a   :  { %3847 = sst [smem:[#allocation64_spill]] %s3410_s5 }
  0x2b   :  { %s3425_s8 = sld [smem:[%s3822_s0 + %s3235_s22]]   ;;  %s3239_s22 = smov 32  }
  0x2c   :  { %s3430_s5 = sld [smem:[%s3822_s0 + %s3236_s28]]   ;;  %s3240_s28 = smov 33  }
  0x2d   :  { %3848 = sst [smem:[#allocation65_spill]] %s3415_s3 }
  0x2e   :  { %s3435_s3 = sld [smem:[%s3822_s0 + %s3237_s7]]   ;;  %s3241_s7 = smov 34  }
  0x2f   :  { %s3440_s30 = sld [smem:[%s3822_s0 + %s3238_s15]]  }
  0x30   :  { %s3455_s19 = sld [smem:[%s3822_s0 + %s3241_s7]]  }
  0x31   :  { %3849 = sst [smem:[#allocation66_spill]] %s3425_s8 }
  0x32   :  { %3850 = sst [smem:[#allocation67_spill]] %s3430_s5 }
  0x33   :  { %s3445_s8 = sld [smem:[%s3822_s0 + %s3239_s22]]  }
  0x34   :  { %s3450_s5 = sld [smem:[%s3822_s0 + %s3240_s28]]  }
  0x35   :  { %75 = vsyncpa [#allocation4], 0 }
  0x36   :  { %76 = vsyncpa [#allocation7], 0 }
  0x37   :  { %77 = vsyncpa [#allocation10], 0 }
  0x38   :  { %78 = vsyncpa [#allocation13], 0 }
  0x39   :  { %79 = vsyncpa [#allocation16], 0 }
  0x3a   :  { %80 = vsyncpa [#allocation19], 0 }
  0x3b   :  { %81 = vsyncpa [#allocation22], 0 }
  0x3c   :  { %82 = vsyncpa [#allocation25], 0 }
  0x3d   :  { %83 = vsyncpa [#allocation28], 0 }
  0x3e   :  { %84 = vsyncpa [#allocation31], 0 }
  0x3f   :  { %85 = vsyncpa [#allocation34], 0 }
  0x40   :  { %86 = vsyncpa [#allocation5], 0 }
  0x41   :  { %87 = vsyncpa [#allocation37], 0  ;;  %s3242_s15 = smov [#allocation6]   ;;  %s3243_s0 = smov [#allocation9]  }
  0x42   :  { %s116_s16 = sshll.u32 %s3242_s15, 4  ;;  %s142_s18 = sshll.u32 %s3243_s0, 4  ;;  %s117_s16 = int_to_ptr.vmem [resolvable:$true] %s116_s16  ;;  %s143_s18 = int_to_ptr.vmem [resolvable:$true] %s142_s18 }
  0x43   :  { %s2698_s22 = scalar_lea.hbm %s3315_s29, 64 }
  0x44   :  { %p2699_p0 = scmp.ne.s32.totalorder %s3315_s29, %s2698_s22  ;;  %p2702_p1 = scmp.lt.u32.totalorder %s2698_s22, %s3315_s29 }
  0x46   :  { %p2704_p2 = pnand %p2702_p1, %p2699_p0 }
  0x48   :  { %2707 = shalt.err (!%p2704_p2)
}
  0x49   :  { %s2708_s23 = scalar_lea.vmem %s117_s16, 64  ;;  %p2713_p4 = scmp.lt.s32.totalorder %s117_s16, %s117_s16 }
  0x4a   :  { %p2709_p3 = scmp.ne.s32.totalorder %s117_s16, %s2708_s23  ;;  %p2714_p5 = scmp.lt.s32.totalorder %s2708_s23, %s2708_s23 }
  0x4c   :  { %p2715_p6 = por %p2714_p5, %p2713_p4 }
  0x4e   :  { %p2716_p7 = pnand %p2715_p6, %p2709_p3 }
  0x50   :  { %2719 = shalt.err (!%p2716_p7)
}
  0x51   :  { %119 = dma.hbm_to_vmem [thread:$0]  %s3315_s29, 64, %s117_s16, [#allocation7]  }
  0x52   :  { %s2720_s26 = scalar_lea.hbm %s3340_s24, 16 }
  0x53   :  { %p2721_p8 = scmp.ne.s32.totalorder %s3340_s24, %s2720_s26  ;;  %p2724_p9 = scmp.lt.u32.totalorder %s2720_s26, %s3340_s24 }
  0x55   :  { %p2726_p10 = pnand %p2724_p9, %p2721_p8 }
  0x57   :  { %2729 = shalt.err (!%p2726_p10)
}
  0x58   :  { %s2730_s28 = scalar_lea.vmem %s143_s18, 16  ;;  %s2734_s1 = scalar_lea.vmem %s143_s18, 32 }
  0x59   :  { %p2731_p11 = scmp.ne.s32.totalorder %s143_s18, %s2730_s28  ;;  %p2735_p12 = scmp.lt.s32.totalorder %s143_s18, %s143_s18 }
  0x5a   :  { %p2736_p13 = scmp.lt.s32.totalorder %s2734_s1, %s2730_s28 }
  0x5c   :  { %p2737_p0 = por %p2736_p13, %p2735_p12 }
  0x5e   :  { %p2738_p1 = pnand %p2737_p0, %p2731_p11 }
  0x60   :  { %2741 = shalt.err (!%p2738_p1)
}
  0x61   :  { %145 = dma.hbm_to_vmem [thread:$0]  %s3340_s24, 16, %s143_s18, [#allocation10]  }
  0x62   :  { %s3244_s2 = smov [#allocation12]   ;;  %s3245_s7 = smov [#allocation15]  }
  0x63   :  { %s164_s29 = sshll.u32 %s3244_s2, 4  ;;  %s183_s10 = sshll.u32 %s3245_s7, 4  ;;  %s165_s29 = int_to_ptr.vmem [resolvable:$true] %s164_s29  ;;  %s3465_s10 = int_to_ptr.vmem [resolvable:$true] %s183_s10 }
  0x64   :  { %s2742_s11 = scalar_lea.hbm %s3355_s12, 64 }
  0x65   :  { %p2743_p2 = scmp.ne.s32.totalorder %s3355_s12, %s2742_s11  ;;  %p2746_p3 = scmp.lt.u32.totalorder %s2742_s11, %s3355_s12 }
  0x67   :  { %p2748_p4 = pnand %p2746_p3, %p2743_p2 }
  0x69   :  { %2751 = shalt.err (!%p2748_p4)
}
  0x6a   :  { %s2752_s15 = scalar_lea.vmem %s165_s29, 64  ;;  %p2757_p6 = scmp.lt.s32.totalorder %s165_s29, %s165_s29 }
  0x6b   :  { %p2753_p5 = scmp.ne.s32.totalorder %s165_s29, %s2752_s15  ;;  %p2758_p7 = scmp.lt.s32.totalorder %s2752_s15, %s2752_s15 }
  0x6d   :  { %p2759_p8 = por %p2758_p7, %p2757_p6 }
  0x6f   :  { %p2760_p9 = pnand %p2759_p8, %p2753_p5 }
  0x71   :  { %2763 = shalt.err (!%p2760_p9)
}
  0x72   :  { %167 = dma.hbm_to_vmem [thread:$0]  %s3355_s12, 64, %s165_s29, [#allocation13]  }
  0x73   :  { %s2764_s24 = scalar_lea.hbm %s3365_s27, 512 }
  0x74   :  { %p2765_p10 = scmp.ne.s32.totalorder %s3365_s27, %s2764_s24  ;;  %p2768_p11 = scmp.lt.u32.totalorder %s2764_s24, %s3365_s27 }
  0x76   :  { %p2770_p12 = pnand %p2768_p11, %p2765_p10 }
  0x78   :  { %2773 = shalt.err (!%p2770_p12)
}
  0x79   :  { %s2774_s16 = scalar_lea.vmem %s3465_s10, 512  ;;  %p2779_p0 = scmp.lt.s32.totalorder %s3465_s10, %s3465_s10 }
  0x7a   :  { %p2775_p13 = scmp.ne.s32.totalorder %s3465_s10, %s2774_s16  ;;  %p2780_p1 = scmp.lt.s32.totalorder %s2774_s16, %s2774_s16 }
  0x7c   :  { %p2781_p2 = por %p2780_p1, %p2779_p0 }
  0x7e   :  { %p2782_p3 = pnand %p2781_p2, %p2775_p13 }
  0x80   :  { %2785 = shalt.err (!%p2782_p3)
}
  0x81   :  { %s3246_s0 = smov 64   ;;  %s3247_s12 = smov 4  }
  0x82   :  { %189 = dma.hbm_to_vmem [thread:$0]  %s3365_s27, 512, %s3465_s10, [#allocation16], %s3246_s0, %s3246_s0, %s3247_s12  }
  0x83   :  { %s3248_s18 = smov [#allocation18]   ;;  %s2786_s23 = scalar_lea.hbm %s3375_s13, 128 }
  0x84   :  { %s206_s22 = sshll.u32 %s3248_s18, 4  ;;  %p2787_p4 = scmp.ne.s32.totalorder %s3375_s13, %s2786_s23  ;;  %s207_s22 = int_to_ptr.vmem [resolvable:$true] %s206_s22 }
  0x85   :  { %p2790_p5 = scmp.lt.u32.totalorder %s2786_s23, %s3375_s13 }
  0x87   :  { %p2792_p6 = pnand %p2790_p5, %p2787_p4 }
  0x89   :  { %2795 = shalt.err (!%p2792_p6)
}
  0x8a   :  { %s2796_s26 = scalar_lea.vmem %s207_s22, 128  ;;  %p2801_p8 = scmp.lt.s32.totalorder %s207_s22, %s207_s22 }
  0x8b   :  { %p2797_p7 = scmp.ne.s32.totalorder %s207_s22, %s2796_s26  ;;  %p2802_p9 = scmp.lt.s32.totalorder %s2796_s26, %s2796_s26 }
  0x8d   :  { %p2803_p10 = por %p2802_p9, %p2801_p8 }
  0x8f   :  { %p2804_p11 = pnand %p2803_p10, %p2797_p7 }
  0x91   :  { %2807 = shalt.err (!%p2804_p11)
}
  0x92   :  { %209 = dma.hbm_to_vmem [thread:$0]  %s3375_s13, 128, %s207_s22, [#allocation19]  }
  0x93   :  { %s3249_s27 = smov [#allocation21]   ;;  %s3250_s1 = smov [#allocation24]  }
  0x94   :  { %s225_s28 = sshll.u32 %s3249_s27, 4  ;;  %s250_s2 = sshll.u32 %s3250_s1, 4  ;;  %s226_s28 = int_to_ptr.vmem [resolvable:$true] %s225_s28  ;;  %s251_s2 = int_to_ptr.vmem [resolvable:$true] %s250_s2 }
  0x95   :  { %s2808_s29 = scalar_lea.hbm %s3385_s21, 512 }
  0x96   :  { %p2809_p12 = scmp.ne.s32.totalorder %s3385_s21, %s2808_s29  ;;  %p2812_p13 = scmp.lt.u32.totalorder %s2808_s29, %s3385_s21 }
  0x98   :  { %p2814_p0 = pnand %p2812_p13, %p2809_p12 }
  0x9a   :  { %2817 = shalt.err (!%p2814_p0)
}
  0x9b   :  { %s2818_s7 = scalar_lea.vmem %s226_s28, 512  ;;  %p2823_p2 = scmp.lt.s32.totalorder %s226_s28, %s226_s28 }
  0x9c   :  { %p2819_p1 = scmp.ne.s32.totalorder %s226_s28, %s2818_s7  ;;  %p2824_p3 = scmp.lt.s32.totalorder %s2818_s7, %s2818_s7 }
  0x9e   :  { %p2825_p4 = por %p2824_p3, %p2823_p2 }
  0xa0   :  { %p2826_p5 = pnand %p2825_p4, %p2819_p1 }
  0xa2   :  { %2829 = shalt.err (!%p2826_p5)
}
  0xa3   :  { %s3251_s10 = smov 128   ;;  %s3252_s13 = smov 8  }
  0xa4   :  { %231 = dma.hbm_to_vmem [thread:$0]  %s3385_s21, 512, %s226_s28, [#allocation22], %s3251_s10, %s3251_s10, %s3252_s13  }
  0xa5   :  { %s2830_s11 = scalar_lea.hbm %s3400_s17, 16 }
  0xa6   :  { %p2831_p6 = scmp.ne.s32.totalorder %s3400_s17, %s2830_s11  ;;  %p2834_p7 = scmp.lt.u32.totalorder %s2830_s11, %s3400_s17 }
  0xa8   :  { %p2836_p8 = pnand %p2834_p7, %p2831_p6 }
  0xaa   :  { %2839 = shalt.err (!%p2836_p8)
}
  0xab   :  { %s2840_s15 = scalar_lea.vmem %s251_s2, 16  ;;  %s2844_s24 = scalar_lea.vmem %s251_s2, 32 }
  0xac   :  { %p2841_p9 = scmp.ne.s32.totalorder %s251_s2, %s2840_s15  ;;  %p2845_p10 = scmp.lt.s32.totalorder %s251_s2, %s251_s2 }
  0xad   :  { %p2846_p11 = scmp.lt.s32.totalorder %s2844_s24, %s2840_s15 }
  0xaf   :  { %p2847_p12 = por %p2846_p11, %p2845_p10 }
  0xb1   :  { %p2848_p13 = pnand %p2847_p12, %p2841_p9 }
  0xb3   :  { %2851 = shalt.err (!%p2848_p13)
}
  0xb4   :  { %253 = dma.hbm_to_vmem [thread:$0]  %s3400_s17, 16, %s251_s2, [#allocation25]  }
  0xb5   :  { %s3253_s21 = smov [#allocation27]   ;;  %s3254_s12 = smov [#allocation30]  }
  0xb6   :  { %s274_s16 = sshll.u32 %s3253_s21, 4  ;;  %s296_s18 = sshll.u32 %s3254_s12, 4  ;;  %s275_s16 = int_to_ptr.vmem [resolvable:$true] %s274_s16  ;;  %s297_s18 = int_to_ptr.vmem [resolvable:$true] %s296_s18 }
  0xb7   :  { %s2852_s22 = scalar_lea.hbm %s3420_s9, 16 }
  0xb8   :  { %p2853_p0 = scmp.ne.s32.totalorder %s3420_s9, %s2852_s22  ;;  %p2856_p1 = scmp.lt.u32.totalorder %s2852_s22, %s3420_s9 }
  0xba   :  { %p2858_p2 = pnand %p2856_p1, %p2853_p0 }
  0xbc   :  { %2861 = shalt.err (!%p2858_p2)
}
  0xbd   :  { %s2862_s23 = scalar_lea.vmem %s275_s16, 16  ;;  %s2866_s26 = scalar_lea.vmem %s275_s16, 32 }
  0xbe   :  { %p2863_p3 = scmp.ne.s32.totalorder %s275_s16, %s2862_s23  ;;  %p2867_p4 = scmp.lt.s32.totalorder %s275_s16, %s275_s16 }
  0xbf   :  { %p2868_p5 = scmp.lt.s32.totalorder %s2866_s26, %s2862_s23 }
  0xc1   :  { %p2869_p6 = por %p2868_p5, %p2867_p4 }
  0xc3   :  { %p2870_p7 = pnand %p2869_p6, %p2863_p3 }
  0xc5   :  { %2873 = shalt.err (!%p2870_p7)
}
  0xc6   :  { %277 = dma.hbm_to_vmem [thread:$0]  %s3420_s9, 16, %s275_s16, [#allocation28]  }
  0xc7   :  { %s2874_s17 = scalar_lea.hbm %s3435_s3, 16 }
  0xc8   :  { %p2875_p8 = scmp.ne.s32.totalorder %s3435_s3, %s2874_s17  ;;  %p2878_p9 = scmp.lt.u32.totalorder %s2874_s17, %s3435_s3 }
  0xca   :  { %p2880_p10 = pnand %p2878_p9, %p2875_p8 }
  0xcc   :  { %2883 = shalt.err (!%p2880_p10)
}
  0xcd   :  { %s2884_s27 = scalar_lea.vmem %s297_s18, 16  ;;  %s2888_s28 = scalar_lea.vmem %s297_s18, 32 }
  0xce   :  { %p2885_p11 = scmp.ne.s32.totalorder %s297_s18, %s2884_s27  ;;  %p2889_p12 = scmp.lt.s32.totalorder %s297_s18, %s297_s18 }
  0xcf   :  { %p2890_p13 = scmp.lt.s32.totalorder %s2888_s28, %s2884_s27 }
  0xd1   :  { %p2891_p0 = por %p2890_p13, %p2889_p12 }
  0xd3   :  { %p2892_p1 = pnand %p2891_p0, %p2885_p11 }
  0xd5   :  { %2895 = shalt.err (!%p2892_p1)
}
  0xd6   :  { %299 = dma.hbm_to_vmem [thread:$0]  %s3435_s3, 16, %s297_s18, [#allocation31]  }
  0xd7   :  { %s3255_s9 = smov [#allocation3]   ;;  %s3256_s2 = smov [#allocation8]  }
  0xd8   :  { %s103_s1 = sshll.u32 %s3255_s9, 4  ;;  %s130_s29 = sshll.u32 %s3256_s2, 4  ;;  %s104_s1 = int_to_ptr.vmem [resolvable:$true] %s103_s1  ;;  %s131_s29 = int_to_ptr.vmem [resolvable:$true] %s130_s29 }
  0xd9   :  { %s2896_s7 = scalar_lea.hbm %s3310_s25, 256 }
  0xda   :  { %p2897_p2 = scmp.ne.s32.totalorder %s3310_s25, %s2896_s7  ;;  %p2900_p3 = scmp.lt.u32.totalorder %s2896_s7, %s3310_s25 }
  0xdc   :  { %p2902_p4 = pnand %p2900_p3, %p2897_p2 }
  0xde   :  { %2905 = shalt.err (!%p2902_p4)
}
  0xdf   :  { %s2906_s11 = scalar_lea.vmem %s104_s1, 256  ;;  %p2911_p6 = scmp.lt.s32.totalorder %s104_s1, %s104_s1 }
  0xe0   :  { %p2907_p5 = scmp.ne.s32.totalorder %s104_s1, %s2906_s11  ;;  %p2912_p7 = scmp.lt.s32.totalorder %s2906_s11, %s2906_s11 }
  0xe2   :  { %p2913_p8 = por %p2912_p7, %p2911_p6 }
  0xe4   :  { %p2914_p9 = pnand %p2913_p8, %p2907_p5 }
  0xe6   :  { %2917 = shalt.err (!%p2914_p9)
}
  0xe7   :  { %109 = dma.hbm_to_vmem [thread:$0]  %s3310_s25, 256, %s104_s1, [#allocation4], %s3251_s10, %s3251_s10, %s3252_s13  }
  0xe8   :  { %s2918_s3 = scalar_lea.hbm %s3330_s14, 16 }
  0xe9   :  { %p2919_p10 = scmp.ne.s32.totalorder %s3330_s14, %s2918_s3  ;;  %p2922_p11 = scmp.lt.u32.totalorder %s2918_s3, %s3330_s14 }
  0xeb   :  { %p2924_p12 = pnand %p2922_p11, %p2919_p10 }
  0xed   :  { %2927 = shalt.err (!%p2924_p12)
}
  0xee   :  { %s2928_s15 = scalar_lea.vmem %s131_s29, 16  ;;  %s2932_s24 = scalar_lea.vmem %s131_s29, 32 }
  0xef   :  { %p2929_p13 = scmp.ne.s32.totalorder %s131_s29, %s2928_s15  ;;  %p2933_p0 = scmp.lt.s32.totalorder %s131_s29, %s131_s29 }
  0xf0   :  { %p2934_p1 = scmp.lt.s32.totalorder %s2932_s24, %s2928_s15 }
  0xf2   :  { %p2935_p2 = por %p2934_p1, %p2933_p0 }
  0xf4   :  { %p2936_p3 = pnand %p2935_p2, %p2929_p13 }
  0xf6   :  { %2939 = shalt.err (!%p2936_p3)
}
  0xf7   :  { %133 = dma.hbm_to_vmem [thread:$0]  %s3330_s14, 16, %s131_s29, [#allocation7]  }
  0xf8   :  { %s3257_s25 = smov [#allocation11]   ;;  %s3258_s13 = smov [#allocation14]  }
  0xf9   :  { %s154_s10 = sshll.u32 %s3257_s25, 4  ;;  %s174_s21 = sshll.u32 %s3258_s13, 4  ;;  %s155_s10 = int_to_ptr.vmem [resolvable:$true] %s154_s10  ;;  %s175_s21 = int_to_ptr.vmem [resolvable:$true] %s174_s21 }
  0xfa   :  { %s2940_s16 = scalar_lea.hbm %s3350_s6, 16 }
  0xfb   :  { %p2941_p4 = scmp.ne.s32.totalorder %s3350_s6, %s2940_s16  ;;  %p2944_p5 = scmp.lt.u32.totalorder %s2940_s16, %s3350_s6 }
  0xfd   :  { %p2946_p6 = pnand %p2944_p5, %p2941_p4 }
  0xff   :  { %2949 = shalt.err (!%p2946_p6)
}
 0x100   :  { %s2950_s12 = scalar_lea.vmem %s155_s10, 16  ;;  %s2954_s18 = scalar_lea.vmem %s155_s10, 32 }
 0x101   :  { %p2951_p7 = scmp.ne.s32.totalorder %s155_s10, %s2950_s12  ;;  %p2955_p8 = scmp.lt.s32.totalorder %s155_s10, %s155_s10 }
 0x102   :  { %p2956_p9 = scmp.lt.s32.totalorder %s2954_s18, %s2950_s12 }
 0x104   :  { %p2957_p10 = por %p2956_p9, %p2955_p8 }
 0x106   :  { %p2958_p11 = pnand %p2957_p10, %p2951_p7 }
 0x108   :  { %2961 = shalt.err (!%p2958_p11)
}
 0x109   :  { %157 = dma.hbm_to_vmem [thread:$0]  %s3350_s6, 16, %s155_s10, [#allocation10]  }
 0x10a   :  { %s2962_s14 = scalar_lea.hbm %s3360_s20, 16 }
 0x10b   :  { %p2963_p12 = scmp.ne.s32.totalorder %s3360_s20, %s2962_s14  ;;  %p2966_p13 = scmp.lt.u32.totalorder %s2962_s14, %s3360_s20 }
 0x10d   :  { %p2968_p0 = pnand %p2966_p13, %p2963_p12 }
 0x10f   :  { %2971 = shalt.err (!%p2968_p0)
}
 0x110   :  { %s2972_s22 = scalar_lea.vmem %s175_s21, 16  ;;  %s2976_s23 = scalar_lea.vmem %s175_s21, 32 }
 0x111   :  { %p2973_p1 = scmp.ne.s32.totalorder %s175_s21, %s2972_s22  ;;  %p2977_p2 = scmp.lt.s32.totalorder %s175_s21, %s175_s21 }
 0x112   :  { %p2978_p3 = scmp.lt.s32.totalorder %s2976_s23, %s2972_s22 }
 0x114   :  { %p2979_p4 = por %p2978_p3, %p2977_p2 }
 0x116   :  { %p2980_p5 = pnand %p2979_p4, %p2973_p1 }
 0x118   :  { %2983 = shalt.err (!%p2980_p5)
}
 0x119   :  { %177 = dma.hbm_to_vmem [thread:$0]  %s3360_s20, 16, %s175_s21, [#allocation13]  }
 0x11a   :  { %s3259_s6 = smov [#allocation17]   ;;  %s3260_s17 = smov [#allocation20]  }
 0x11b   :  { %s196_s26 = sshll.u32 %s3259_s6, 4  ;;  %s216_s27 = sshll.u32 %s3260_s17, 4  ;;  %s197_s26 = int_to_ptr.vmem [resolvable:$true] %s196_s26  ;;  %s217_s27 = int_to_ptr.vmem [resolvable:$true] %s216_s27 }
 0x11c   :  { %s2984_s28 = scalar_lea.hbm %s3370_s4, 16 }
 0x11d   :  { %p2985_p6 = scmp.ne.s32.totalorder %s3370_s4, %s2984_s28  ;;  %p2988_p7 = scmp.lt.u32.totalorder %s2984_s28, %s3370_s4 }
 0x11f   :  { %p2990_p8 = pnand %p2988_p7, %p2985_p6 }
 0x121   :  { %2993 = shalt.err (!%p2990_p8)
}
 0x122   :  { %s2994_s9 = scalar_lea.vmem %s197_s26, 16  ;;  %s2998_s1 = scalar_lea.vmem %s197_s26, 32 }
 0x123   :  { %p2995_p9 = scmp.ne.s32.totalorder %s197_s26, %s2994_s9  ;;  %p2999_p10 = scmp.lt.s32.totalorder %s197_s26, %s197_s26 }
 0x124   :  { %p3000_p11 = scmp.lt.s32.totalorder %s2998_s1, %s2994_s9 }
 0x126   :  { %p3001_p12 = por %p3000_p11, %p2999_p10 }
 0x128   :  { %p3002_p13 = pnand %p3001_p12, %p2995_p9 }
 0x12a   :  { %3005 = shalt.err (!%p3002_p13)
}
 0x12b   :  { %s3851_s20 = sld [smem:[#allocation60_spill]] }
 0x12c   :  { %199 = dma.hbm_to_vmem [thread:$0]  %s3370_s4, 16, %s197_s26, [#allocation16]  }
 0x131   :  { %s3006_s2 = scalar_lea.hbm %s3851_s20, 16 }
 0x132   :  { %p3007_p0 = scmp.ne.s32.totalorder %s3851_s20, %s3006_s2  ;;  %p3010_p1 = scmp.lt.u32.totalorder %s3006_s2, %s3851_s20 }
 0x134   :  { %p3012_p2 = pnand %p3010_p1, %p3007_p0 }
 0x136   :  { %3015 = shalt.err (!%p3012_p2)
}
 0x137   :  { %s3016_s29 = scalar_lea.vmem %s217_s27, 16  ;;  %s3020_s7 = scalar_lea.vmem %s217_s27, 32 }
 0x138   :  { %p3017_p3 = scmp.ne.s32.totalorder %s217_s27, %s3016_s29  ;;  %p3021_p4 = scmp.lt.s32.totalorder %s217_s27, %s217_s27 }
 0x139   :  { %p3022_p5 = scmp.lt.s32.totalorder %s3020_s7, %s3016_s29 }
 0x13b   :  { %p3023_p6 = por %p3022_p5, %p3021_p4 }
 0x13d   :  { %p3024_p7 = pnand %p3023_p6, %p3017_p3 }
 0x13f   :  { %3027 = shalt.err (!%p3024_p7)
}
 0x140   :  { %s3852_s11 = sld [smem:[#allocation61_spill]]  ;;  %s3261_s4 = smov [#allocation23]  }
 0x141   :  { %219 = dma.hbm_to_vmem [thread:$0]  %s3851_s20, 16, %s217_s27, [#allocation19]  }
 0x142   :  { %s238_s3 = sshll.u32 %s3261_s4, 4  ;;  %s3262_s15 = smov [#allocation26]   ;;  %s239_s3 = int_to_ptr.vmem [resolvable:$true] %s238_s3 }
 0x143   :  { %s262_s24 = sshll.u32 %s3262_s15, 4  ;;  %s263_s24 = int_to_ptr.vmem [resolvable:$true] %s262_s24 }
 0x146   :  { %s3028_s25 = scalar_lea.hbm %s3852_s11, 16 }
 0x147   :  { %p3029_p8 = scmp.ne.s32.totalorder %s3852_s11, %s3028_s25  ;;  %p3032_p9 = scmp.lt.u32.totalorder %s3028_s25, %s3852_s11 }
 0x149   :  { %p3034_p10 = pnand %p3032_p9, %p3029_p8 }
 0x14b   :  { %3037 = shalt.err (!%p3034_p10)
}
 0x14c   :  { %s3038_s10 = scalar_lea.vmem %s239_s3, 16  ;;  %s3042_s13 = scalar_lea.vmem %s239_s3, 32 }
 0x14d   :  { %p3039_p11 = scmp.ne.s32.totalorder %s239_s3, %s3038_s10  ;;  %p3043_p12 = scmp.lt.s32.totalorder %s239_s3, %s239_s3 }
 0x14e   :  { %p3044_p13 = scmp.lt.s32.totalorder %s3042_s13, %s3038_s10 }
 0x150   :  { %p3045_p0 = por %p3044_p13, %p3043_p12 }
 0x152   :  { %p3046_p1 = pnand %p3045_p0, %p3039_p11 }
 0x154   :  { %3049 = shalt.err (!%p3046_p1)
}
 0x155   :  { %s3853_s21 = sld [smem:[#allocation64_spill]] }
 0x156   :  { %241 = dma.hbm_to_vmem [thread:$0]  %s3852_s11, 16, %s239_s3, [#allocation22]  }
 0x15b   :  { %s3050_s16 = scalar_lea.hbm %s3853_s21, 16 }
 0x15c   :  { %p3051_p2 = scmp.ne.s32.totalorder %s3853_s21, %s3050_s16  ;;  %p3054_p3 = scmp.lt.u32.totalorder %s3050_s16, %s3853_s21 }
 0x15e   :  { %p3056_p4 = pnand %p3054_p3, %p3051_p2 }
 0x160   :  { %3059 = shalt.err (!%p3056_p4)
}
 0x161   :  { %s3060_s12 = scalar_lea.vmem %s263_s24, 16  ;;  %s3064_s18 = scalar_lea.vmem %s263_s24, 32 }
 0x162   :  { %p3061_p5 = scmp.ne.s32.totalorder %s263_s24, %s3060_s12  ;;  %p3065_p6 = scmp.lt.s32.totalorder %s263_s24, %s263_s24 }
 0x163   :  { %p3066_p7 = scmp.lt.s32.totalorder %s3064_s18, %s3060_s12 }
 0x165   :  { %p3067_p8 = por %p3066_p7, %p3065_p6 }
 0x167   :  { %p3068_p9 = pnand %p3067_p8, %p3061_p5 }
 0x169   :  { %3071 = shalt.err (!%p3068_p9)
}
 0x16a   :  { %s3854_s14 = sld [smem:[#allocation67_spill]]  ;;  %s3263_s22 = smov [#allocation29]  }
 0x16b   :  { %265 = dma.hbm_to_vmem [thread:$0]  %s3853_s21, 16, %s263_s24, [#allocation25]  }
 0x16c   :  { %s286_s23 = sshll.u32 %s3263_s22, 4  ;;  %s3264_s6 = smov [#allocation32]   ;;  %s287_s23 = int_to_ptr.vmem [resolvable:$true] %s286_s23 }
 0x16d   :  { %s306_s26 = sshll.u32 %s3264_s6, 4  ;;  %s307_s26 = int_to_ptr.vmem [resolvable:$true] %s306_s26 }
 0x170   :  { %s3072_s17 = scalar_lea.hbm %s3854_s14, 16 }
 0x171   :  { %p3073_p10 = scmp.ne.s32.totalorder %s3854_s14, %s3072_s17  ;;  %p3076_p11 = scmp.lt.u32.totalorder %s3072_s17, %s3854_s14 }
 0x173   :  { %p3078_p12 = pnand %p3076_p11, %p3073_p10 }
 0x175   :  { %3081 = shalt.err (!%p3078_p12)
}
 0x176   :  { %s3082_s27 = scalar_lea.vmem %s287_s23, 16  ;;  %s3086_s28 = scalar_lea.vmem %s287_s23, 32 }
 0x177   :  { %p3083_p13 = scmp.ne.s32.totalorder %s287_s23, %s3082_s27  ;;  %p3087_p0 = scmp.lt.s32.totalorder %s287_s23, %s287_s23 }
 0x178   :  { %p3088_p1 = scmp.lt.s32.totalorder %s3086_s28, %s3082_s27 }
 0x17a   :  { %p3089_p2 = por %p3088_p1, %p3087_p0 }
 0x17c   :  { %p3090_p3 = pnand %p3089_p2, %p3083_p13 }
 0x17e   :  { %3093 = shalt.err (!%p3090_p3)
}
 0x17f   :  { %289 = dma.hbm_to_vmem [thread:$0]  %s3854_s14, 16, %s287_s23, [#allocation28]  }
 0x180   :  { %s3094_s9 = scalar_lea.hbm %s3440_s30, 16 }
 0x181   :  { %p3095_p4 = scmp.ne.s32.totalorder %s3440_s30, %s3094_s9  ;;  %p3098_p5 = scmp.lt.u32.totalorder %s3094_s9, %s3440_s30 }
 0x183   :  { %p3100_p6 = pnand %p3098_p5, %p3095_p4 }
 0x185   :  { %3103 = shalt.err (!%p3100_p6)
}
 0x186   :  { %s3104_s1 = scalar_lea.vmem %s307_s26, 16  ;;  %s3108_s20 = scalar_lea.vmem %s307_s26, 32 }
 0x187   :  { %p3105_p7 = scmp.ne.s32.totalorder %s307_s26, %s3104_s1  ;;  %p3109_p8 = scmp.lt.s32.totalorder %s307_s26, %s307_s26 }
 0x188   :  { %p3110_p9 = scmp.lt.s32.totalorder %s3108_s20, %s3104_s1 }
 0x18a   :  { %p3111_p10 = por %p3110_p9, %p3109_p8 }
 0x18c   :  { %p3112_p11 = pnand %p3111_p10, %p3105_p7 }
 0x18e   :  { %3115 = shalt.err (!%p3112_p11)
}
 0x18f   :  { %309 = dma.hbm_to_vmem [thread:$0]  %s3440_s30, 16, %s307_s26, [#allocation31]  }
 0x190   :  { %s3265_s2 = smov [#allocation33]   ;;  %s3116_s7 = scalar_lea.hbm %s3445_s8, 16 }
 0x191   :  { %s316_s29 = sshll.u32 %s3265_s2, 4  ;;  %p3117_p12 = scmp.ne.s32.totalorder %s3445_s8, %s3116_s7  ;;  %s317_s29 = int_to_ptr.vmem [resolvable:$true] %s316_s29 }
 0x192   :  { %p3120_p13 = scmp.lt.u32.totalorder %s3116_s7, %s3445_s8 }
 0x194   :  { %p3122_p0 = pnand %p3120_p13, %p3117_p12 }
 0x196   :  { %3125 = shalt.err (!%p3122_p0)
}
 0x197   :  { %s3126_s11 = scalar_lea.vmem %s317_s29, 16  ;;  %s3130_s4 = scalar_lea.vmem %s317_s29, 32 }
 0x198   :  { %p3127_p1 = scmp.ne.s32.totalorder %s317_s29, %s3126_s11  ;;  %p3131_p2 = scmp.lt.s32.totalorder %s317_s29, %s317_s29 }
 0x199   :  { %p3132_p3 = scmp.lt.s32.totalorder %s3130_s4, %s3126_s11 }
 0x19b   :  { %p3133_p4 = por %p3132_p3, %p3131_p2 }
 0x19d   :  { %p3134_p5 = pnand %p3133_p4, %p3127_p1 }
 0x19f   :  { %3137 = shalt.err (!%p3134_p5)
}
 0x1a0   :  { %319 = dma.hbm_to_vmem [thread:$0]  %s3445_s8, 16, %s317_s29, [#allocation34]  }
 0x1a1   :  { %3182 = dma.done.wait [#allocation4], 256  }
 0x1a2   :  { %3183 = vsyncadd [#allocation4], 4294967040 }
 0x1a3   :  { %3184 = dma.done.wait [#allocation7], 80  }
 0x1a4   :  { %3185 = vsyncadd [#allocation7], 4294967216 }
 0x1a5   :  { %3186 = dma.done.wait [#allocation10], 32  }
 0x1a6   :  { %3187 = vsyncadd [#allocation10], 4294967264 }
 0x1a7   :  { %3188 = dma.done.wait [#allocation13], 80  }
 0x1a8   :  { %3189 = vsyncadd [#allocation13], 4294967216 }
 0x1a9   :  { %3190 = dma.done.wait [#allocation16], 528  }
 0x1aa   :  { %3191 = vsyncadd [#allocation16], 4294966768 }
 0x1ab   :  { %3192 = dma.done.wait [#allocation19], 144  }
 0x1ac   :  { %3193 = vsyncadd [#allocation19], 4294967152 }
 0x1ad   :  { %3194 = dma.done.wait [#allocation22], 528  }
 0x1ae   :  { %3195 = vsyncadd [#allocation22], 4294966768 }
 0x1af   :  { %3196 = dma.done.wait [#allocation25], 32  }
 0x1b0   :  { %3197 = vsyncadd [#allocation25], 4294967264 }
 0x1b1   :  { %3198 = dma.done.wait [#allocation28], 32  }
 0x1b2   :  { %3199 = vsyncadd [#allocation28], 4294967264 }
 0x1b3   :  { %3200 = dma.done.wait [#allocation31], 32  }
 0x1b4   :  { %3201 = vsyncadd [#allocation31], 4294967264 }
 0x1b5   :  { %3202 = dma.done.wait [#allocation34], 16  }
 0x1b6   :  { %3203 = vsyncadd [#allocation34], 4294967280  ;;  %s3855_s8 = sld [smem:[#allocation52_spill]]  ;;  %s3856_s30 = sld [smem:[#allocation51_spill]]  ;;  %v3266_v0 = vmov 0   ;;  %v3267_v1 = vmov 1   ;;  %v385_v17 = vlaneseq }
 0x1b7   :  { %2617 = vset.pattern.permute.xlu0 %v3266_v0  ;;  %2618 = vset.pattern.permute.xlu1 %v3267_v1  ;;  %v3268_v2 = vmov 0.0|0.0   ;;  %v3269_v3 = vmov 0.0   ;;  %s3857_s3 = sld [smem:[#allocation57_spill]]  ;;  %v413_v6 = vld [vmem:[#allocation3] sm:$0xff]  ;;  %v414_v7 = vld [vmem:[#allocation3 + $0x8] sm:$0xff]  ;;  %vm3270_vm0 = vmmov 0  }
 0x1b8   :  { %2539 = vmatprep.subr.bf16.mxu0 %v3268_v2  ;;  %2347 = vmatprep.subr.bf16.mxu1 %v3269_v3  ;;  %v2540_v8 = vpack.c.bf16 %v414_v7, %v413_v6  ;;  %v3271_v9 = vmov 2   ;;  %s3858_s15 = sld [smem:[#allocation54_spill]]  ;;  %v406_v18 = vand.u32 127, %v385_v17  ;;  %vm415_vm1 = vcmask 130048   ;;  %s3859_s24 = sld [smem:[#allocation56_spill]] }
 0x1b9   :  { %2344 = vmatprep.mubr.msk.f32.mxu0 %vm3270_vm0, %v3269_v3  ;;  %2363 = vmatprep.mubr.msk.bf16.mxu1 %vm3270_vm0, %v3269_v3  ;;  %v3584_v22 = vshrl.u32 %v385_v17, 7  ;;  %vm394_vm3 = vcmask 58368   ;;  %v489_v28 = vld [vmem:[#allocation6] sm:$0x7]  ;;  %s3860_s25 = sld [smem:[#allocation59_spill]]  ;;  %s3861_s10 = sld [smem:[#allocation55_spill]] }
 0x1ba   :  { %2541 = vmatpush3.bf16.msra.mxu0 %v2540_v8  ;;  %v3272_v57 = vmov 3   ;;  %v3273_v58 = vmov 4   ;;  %v3274_v59 = vmov 5   ;;  %s3862_s13 = sld [smem:[#allocation58_spill]]  ;;  %v2168_v62 = vld [vmem:[#allocation8] ss:$0 sm:$0xff] }
 0x1bb   :  { %2367 = vmatprep.subr.mxu0 %v3269_v3  ;;  %v3593_v26 = vsub.s32 1, %v3584_v22  ;;  %v3596_v27 = vsub.s32 0, %v3584_v22  ;;  %v3603_v32 = vsub.s32 2, %v3584_v22  ;;  %vm643_vm5 = vcmask 64512   ;;  %s3863_s21 = sld [smem:[#allocation62_spill]]  ;;  %s3865_s16 = sld [smem:[#allocation63_spill]] }
 0x1bc   :  { %v382_v4 = vld [vmem:[%s3855_s8] sm:$0xff]  ;;  %vm1023_vm6 = vcmask 261120   ;;  %vm1139_vm7 = vcmask 523264   ;;  %vm1374_vm10 = vcmask 1048064   ;;  %s3866_s12 = sld [smem:[#allocation65_spill]]  ;;  %s3867_s18 = sld [smem:[#allocation66_spill]] }
 0x1bd   :  { %v381_v5 = vld [vmem:[%s3856_s30] sm:$0xff]  ;;  %408 = vperm.xlu0 %2617, %v382_v4   ;;  %v2633_v11 = vld [vmem:[%s3857_s3 + $0x8] sm:$0xff]   ;;  %v2634_v12 = vld [vmem:[%s3857_s3 + $0x10] sm:$0xff]   ;;  %v508_v30 = vrot.slane %v489_v28, %v3593_v26  ;;  %v499_v31 = vrot.slane %v489_v28, %v3596_v27  ;;  %v518_v36 = vrot.slane %v489_v28, %v3603_v32  ;;  %s3275_s14 = smov [#allocation35]  }
 0x1be   :  { %502 = vperm.xlu1 %2618, %v381_v5   ;;  %v2632_v10 = vld [vmem:[%s3857_s3] sm:$0xff]   ;;  %v2635_v13 = vld [vmem:[%s3857_s3 + $0x18] sm:$0xff]   ;;  %v2637_v15 = vld [vmem:[%s3857_s3 + $0x28] sm:$0xff]   ;;  %s2096_s22 = sshll.u32 %s3275_s14, 4  ;;  %s2097_s22 = int_to_ptr.vmem [resolvable:$true] %s2096_s22 }
 0x1bf   :  { %2348 = vmatpush3.bf16.msra.mxu1 %v2632_v10  ;;  %v2636_v14 = vld [vmem:[%s3857_s3 + $0x20] sm:$0xff]   ;;  %v2638_v16 = vld [vmem:[%s3857_s3 + $0x30] sm:$0xff]   ;;  %v2639_v21 = vld [vmem:[%s3857_s3 + $0x38] sm:$0xff]   ;;  %s3138_s23 = scalar_lea.vmem %s2097_s22, 32  ;;  %p3143_p7 = scmp.lt.s32.totalorder %s2097_s22, %s2097_s22 }
 0x1c0   :  { %2349 = vmatprep.subr.bf16.mxu1 %v3269_v3  ;;  %v2163_v23 = vld [vmem:[%s3858_s15] ss:$0 sm:$0xff]  ;;  %v2641_v49 = vld [vmem:[%s3860_s25 + $0x8] sm:$0xff]   ;;  %v2642_v50 = vld [vmem:[%s3860_s25 + $0x10] sm:$0xff]   ;;  %p3139_p6 = scmp.ne.s32.totalorder %s2097_s22, %s3138_s23  ;;  %p3144_p8 = scmp.lt.s32.totalorder %s3138_s23, %s3138_s23 }
 0x1c1   :  { %493 = vperm.xlu0 %2617, %v381_v5   ;;  %vm391_vm4 = vcmp.eq.s32.totalorder %v3584_v22, %v2163_v23  ;;  %v2167_v41 = vld [vmem:[%s3859_s24] ss:$0 sm:$0xff]  ;;  %v2643_v51 = vld [vmem:[%s3860_s25 + $0x18] sm:$0xff]   ;;  %v2645_v53 = vld [vmem:[%s3860_s25 + $0x28] sm:$0xff]  }
 0x1c2   :  { %2619 = vset.pattern.permute.xlu1 %v3271_v9  ;;  %v3589_v24 = vsel %vm391_vm4, 1.0, %v3269_v3  ;;  %v2640_v47 = vld [vmem:[%s3860_s25] sm:$0xff]   ;;  %v2646_v54 = vld [vmem:[%s3860_s25 + $0x30] sm:$0xff]   ;;  %v2647_v55 = vld [vmem:[%s3860_s25 + $0x38] sm:$0xff]   ;;  %p3145_p9 = por %p3144_p8, %p3143_p7 }
 0x1c3   :  { %512 = vperm.xlu1 %2619, %v381_v5   ;;  %2350 = vmatpush3.bf16.msra.mxu1 %v2633_v11  ;;  %v395_v25 = vsel %vm394_vm3, %v3589_v24, 0.0  ;;  %v2644_v52 = vld [vmem:[%s3860_s25 + $0x20] sm:$0xff]   ;;  %v2649_v11 = vld [vmem:[%s3862_s13 + $0x8] sm:$0xff]   ;;  %v2655_v17 = vld [vmem:[%s3862_s13 + $0x38] sm:$0xff]  }
 0x1c4   :  { %2351 = vmatprep.subr.bf16.mxu1 %v3269_v3  ;;  %v941_v56 = vld [vmem:[%s3861_s10] sm:$0x3]  ;;  %p3146_p10 = pnand %p3145_p9, %p3139_p6 }
 0x1c5   :  { %v2648_v10 = vld [vmem:[%s3862_s13] sm:$0xff]  }
 0x1c7   :  { %2620 = vset.pattern.permute.xlu1 %v3266_v0  ;;  %2352 = vmatpush3.bf16.msra.mxu1 %v2634_v12  ;;  %v2650_v12 = vld [vmem:[%s3862_s13 + $0x10] sm:$0xff]  }
 0x1c8   :  { %2353 = vmatprep.subr.bf16.mxu1 %v3269_v3  ;;  %946 = vperm.xlu1 %2620, %v941_v56  }
 0x1cb   :  { %2354 = vmatpush3.bf16.msra.mxu1 %v2635_v13  ;;  %v2651_v13 = vld [vmem:[%s3862_s13 + $0x18] sm:$0xff]  }
 0x1cc   :  { %2355 = vmatprep.subr.bf16.mxu1 %v3269_v3  ;;  %2621 = vset.pattern.permute.xlu1 %v3267_v1 }
 0x1cd   :  { %955 = vperm.xlu1 %2621, %v941_v56  }
 0x1cf   :  { %2356 = vmatpush3.bf16.msra.mxu1 %v2636_v14  ;;  %v2652_v14 = vld [vmem:[%s3862_s13 + $0x20] sm:$0xff]  }
 0x1d0   :  { %2357 = vmatprep.subr.bf16.mxu1 %v3269_v3 }
 0x1d1   :  { %2622 = vset.pattern.permute.xlu1 %v3271_v9 }
 0x1d2   :  { %965 = vperm.xlu1 %2622, %v941_v56  }
 0x1d3   :  { %2358 = vmatpush3.bf16.msra.mxu1 %v2637_v15  ;;  %v2653_v15 = vld [vmem:[%s3862_s13 + $0x28] sm:$0xff]  }
 0x1d4   :  { %2359 = vmatprep.subr.bf16.mxu1 %v3269_v3 }
 0x1d6   :  { %2623 = vset.pattern.permute.xlu1 %v3272_v57 }
 0x1d7   :  { %2360 = vmatpush3.bf16.msra.mxu1 %v2638_v16  ;;  %975 = vperm.xlu1 %2623, %v941_v56   ;;  %v2654_v16 = vld [vmem:[%s3862_s13 + $0x30] sm:$0xff]  }
 0x1d8   :  { %2361 = vmatprep.subr.bf16.mxu1 %v3269_v3 }
 0x1db   :  { %2362 = vmatpush3.bf16.msra.mxu1 %v2639_v21  ;;  %2624 = vset.pattern.permute.xlu1 %v3273_v58 }
 0x1dc   :  { %2392 = vmatprep.subr.bf16.mxu1 %v3269_v3  ;;  %985 = vperm.xlu1 %2624, %v941_v56  }
 0x1e0   :  { %396 = vadd.xlane.f32.xlu0 %v395_v25  ;;  %2625 = vset.pattern.permute.xlu1 %v3274_v59 }
 0x1e1   :  { %995 = vperm.xlu1 %2625, %v941_v56  }
 0x1e5   :  { %2626 = vset.pattern.permute.xlu1 %v3266_v0 }
 0x23c   :  { %v409_v19 = vpop.permute.xlu0 %408 }
 0x23d   :  { %vm410_vm2 = vcmp.eq.s32.totalorder %v406_v18, %v409_v19  ;;  %v3598_v29 = vpop.permute.xlu1 %502 }
 0x23e   :  { %v2165_v20 = vsel %vm410_vm2, 1.0, %v3269_v3  ;;  %v509_v34 = vmul.f32 %v508_v30, %v3598_v29 }
 0x23f   :  { %2345 = vmatmul.mubr.msk.f32.vlgmr.msra.gmra.mrb[0].mxu0 %vm415_vm1, %v2165_v20  ;;  %v942_v20 = vld [vmem:[#allocation18] sm:$0x3f] }
 0x240   :  { %2369 = vmatprep.mubr.msk.f32.mxu0 %vm3270_vm0, %v3269_v3  ;;  %v3605_v33 = vpop.permute.xlu0 %493  ;;  %v952_v23 = vrot.slane %v942_v20, %v3596_v27  ;;  %v971_v30 = vrot.slane %v942_v20, %v3603_v32 }
 0x241   :  { %v500_v35 = vmul.f32 %v499_v31, %v3605_v33  ;;  %v980_v31 = vsub.s32 3, %v3584_v22 }
 0x242   :  { %v3610_v37 = vpop.permute.xlu1 %512 }
 0x243   :  { %v510_v38 = vadd.f32 %v509_v34, %v500_v35  ;;  %v519_v39 = vmul.f32 %v518_v36, %v3610_v37 }
 0x245   :  { %v520_v40 = vadd.f32 %v519_v39, %v510_v38  ;;  %v981_v38 = vrot.slane %v942_v20, %v980_v31  ;;  %v990_v39 = vsub.s32 4, %v3584_v22 }
 0x247   :  { %v527_v42 = vadd.f32 %v2167_v41, %v520_v40  ;;  %v947_v18 = vpop.permute.xlu1 %946 }
 0x248   :  { %v953_v25 = vmul.f32 %v952_v23, %v947_v18 }
 0x249   :  { %v528_v43 = vmax.f32 %v527_v42, 0.0 }
 0x24c   :  { %v956_v19 = vpop.permute.xlu1 %955 }
 0x251   :  { %v966_v21 = vpop.permute.xlu1 %965 }
 0x252   :  { %v972_v36 = vmul.f32 %v971_v30, %v966_v21 }
 0x256   :  { %v976_v34 = vpop.permute.xlu1 %975 }
 0x257   :  { %v982_v42 = vmul.f32 %v981_v38, %v976_v34 }
 0x25b   :  { %v986_v40 = vpop.permute.xlu1 %985 }
 0x26d   :  { %v397_v60 = vpop.xlane.xlu0 %396 }
 0x26e   :  { %v398_v61 = vmax.f32 %v397_v60, 1.0 }
 0x270   :  { %2692 = vrcp.f32 %v398_v61  ;;  %v1015_v61 = vld [vmem:[#allocation21 + $0x18] sm:$0xff] }
 0x27a   :  { %v2693_v63 = vpop.eup %2692 }
 0x27b   :  { %v3637_v6 = vmul.f32 %v2693_v63, %v3589_v24  ;;  %v961_v24 = vrot.slane %v942_v20, %v3593_v26 }
 0x27d   :  { %v962_v28 = vmul.f32 %v961_v24, %v956_v19 }
 0x27f   :  { %v963_v35 = vadd.f32 %v962_v28, %v953_v25  ;;  %v2197_v28 = vld [vmem:[#allocation23] ss:$0 sm:$0xff] }
 0x281   :  { %v973_v41 = vadd.f32 %v972_v36, %v963_v35 }
 0x312   :  { %v485_v44 = vpop.f32.mrb[0].mxu0 }
 0x313   :  { %v529_v45 = vadd.f32 %v528_v43, %v485_v44  ;;  %v2346_v46 = vpop.f32.mrb[1].mxu0  ;;  %v991_v43 = vrot.slane %v942_v20, %v990_v39  ;;  %v1000_v44 = vsub.s32 5, %v3584_v22  ;;  %v1014_v22 = vld [vmem:[#allocation21 + $0x10] sm:$0xff] }
 0x314   :  { %v983_v46 = vadd.f32 %v982_v42, %v973_v41  ;;  %v2664_v39 = vld [vmem:[#allocation15] sm:$0xff]  }
 0x315   :  { %v547_v48 = vpack.c.bf16 %v529_v45, %v529_v45  ;;  %v2658_v45 = vld [vmem:[%s3863_s21 + $0x20] sm:$0xff]  }
 0x317   :  { %2364 = vmatmul.mubr.bf16.vlgmr.msra.gmra.mrb[0].mxu1 %v547_v48  ;;  %v1001_v48 = vrot.slane %v942_v20, %v1000_v44 }
 0x318   :  { %2393 = vmatpush3.bf16.msra.mxu1 %v2640_v47  ;;  %2408 = vmatprep.mubr.msk.bf16.mxu1 %vm3270_vm0, %v3269_v3  ;;  %v992_v47 = vmul.f32 %v991_v43, %v986_v40  ;;  %v2665_v43 = vld [vmem:[#allocation15 + $0x8] sm:$0xff]  }
 0x319   :  { %2394 = vmatprep.subr.bf16.mxu1 %v3269_v3 }
 0x31c   :  { %2395 = vmatpush3.bf16.msra.mxu1 %v2641_v49  ;;  %v996_v49 = vpop.permute.xlu1 %995 }
 0x31d   :  { %2396 = vmatprep.subr.bf16.mxu1 %v3269_v3 }
 0x320   :  { %2397 = vmatpush3.bf16.msra.mxu1 %v2642_v50  ;;  %v993_v50 = vadd.f32 %v992_v47, %v983_v46 }
 0x321   :  { %2398 = vmatprep.subr.bf16.mxu1 %v3269_v3 }
 0x324   :  { %2399 = vmatpush3.bf16.msra.mxu1 %v2643_v51  ;;  %v1002_v51 = vmul.f32 %v1001_v48, %v996_v49 }
 0x325   :  { %2400 = vmatprep.subr.bf16.mxu1 %v3269_v3 }
 0x326   :  { %v1003_v57 = vadd.f32 %v1002_v51, %v993_v50 }
 0x328   :  { %2401 = vmatpush3.bf16.msra.mxu1 %v2644_v52  ;;  %v1012_v52 = vld [vmem:[#allocation21] sm:$0xff] }
 0x329   :  { %2402 = vmatprep.subr.bf16.mxu1 %v3269_v3 }
 0x32c   :  { %2403 = vmatpush3.bf16.msra.mxu1 %v2645_v53  ;;  %v1013_v53 = vld [vmem:[#allocation21 + $0x8] sm:$0xff] }
 0x32d   :  { %2404 = vmatprep.subr.bf16.mxu1 %v3269_v3  ;;  %v2543_v56 = vpack.c.bf16 %v1013_v53, %v1012_v52 }
 0x330   :  { %2405 = vmatpush3.bf16.msra.mxu1 %v2646_v54  ;;  %v2187_v54 = vld [vmem:[#allocation11] ss:$0 sm:$0xff] }
 0x331   :  { %2406 = vmatprep.subr.bf16.mxu1 %v3269_v3 }
 0x334   :  { %2407 = vmatpush3.bf16.msra.mxu1 %v2647_v55 }
 0x335   :  { %2423 = vmatprep.subr.bf16.mxu1 %v3269_v3 }
 0x3ea   :  { %v636_v1 = vpop.f32.mrb[0].mxu1 }
 0x3eb   :  { %v637_v4 = vadd.f32 %v2168_v62, %v636_v1  ;;  %v2365_v5 = vpop.f32.mrb[1].mxu1  ;;  %v2196_v62 = vld [vmem:[#allocation20] ss:$0 sm:$0xff] }
 0x3ec   :  { %v639_v7 = vpop.f32.mrb[2].mxu1 }
 0x3ed   :  { %v642_v8 = vmax.f32 %v637_v4, 0.0  ;;  %v2366_v9 = vpop.f32.mrb[3].mxu1  ;;  %v2546_v7 = vpack.c.bf16 %v1015_v61, %v1014_v22  ;;  %v2211_v61 = vld [vmem:[#allocation17] ss:$0 sm:$0xff] }
 0x3ee   :  { %v2656_v9 = vld [vmem:[%s3863_s21] sm:$0xff]  }
 0x3ef   :  { %v846_v0 = vpack.c.bf16 %v642_v8, %v642_v8  ;;  %2368 = vmatpush3.msra.mxu0 %v642_v8  ;;  %v1010_v8 = vadd.f32 %v2196_v62, %v1003_v57 }
 0x3f0   :  { %2370 = vmatmul.mubr.msk.f32.vlgmr.msra.gmra.mrb[2].mxu0 %vm643_vm5, %v3637_v6  ;;  %2372 = vmatprep.subr.bf16.mxu0 %v3269_v3 }
 0x3f1   :  { %2409 = vmatmul.mubr.bf16.vlgmr.msra.gmra.mrb[4].mxu1 %v846_v0  ;;  %2373 = vmatpush3.bf16.msra.mxu0 %v2648_v10  ;;  %v1011_v10 = vmax.f32 %v1010_v8, 0.0  ;;  %v2657_v0 = vld [vmem:[%s3863_s21 + $0x8] sm:$0xff]  }
 0x3f2   :  { %2374 = vmatprep.subr.bf16.mxu0 %v3269_v3  ;;  %2388 = vmatprep.mubr.msk.bf16.mxu0 %vm3270_vm0, %v3269_v3 }
 0x3f3   :  { %2431 = vmatprep.mubr.msk.bf16.mxu1 %vm3270_vm0, %v3269_v3  ;;  %2424 = vmatpush3.bf16.msra.mxu1 %v2658_v45 }
 0x3f4   :  { %2425 = vmatprep.subr.bf16.mxu1 %v3269_v3 }
 0x3f5   :  { %2375 = vmatpush3.bf16.msra.mxu0 %v2649_v11  ;;  %v2660_v11 = vld [vmem:[%s3863_s21 + $0x28] sm:$0xff]  }
 0x3f6   :  { %2376 = vmatprep.subr.bf16.mxu0 %v3269_v3 }
 0x3f7   :  { %2426 = vmatpush3.bf16.msra.mxu1 %v2660_v11 }
 0x3f8   :  { %2427 = vmatprep.subr.bf16.mxu1 %v3269_v3 }
 0x3f9   :  { %2377 = vmatpush3.bf16.msra.mxu0 %v2650_v12  ;;  %v2661_v12 = vld [vmem:[%s3863_s21 + $0x18] sm:$0xff]  }
 0x3fa   :  { %2378 = vmatprep.subr.bf16.mxu0 %v3269_v3 }
 0x3fd   :  { %2379 = vmatpush3.bf16.msra.mxu0 %v2651_v13  ;;  %v2662_v13 = vld [vmem:[%s3863_s21 + $0x30] sm:$0xff]  }
 0x3fe   :  { %2380 = vmatprep.subr.bf16.mxu0 %v3269_v3  ;;  %2428 = vmatpush3.bf16.msra.mxu1 %v2662_v13 }
 0x3ff   :  { %2429 = vmatprep.subr.bf16.mxu1 %v3269_v3 }
 0x401   :  { %2381 = vmatpush3.bf16.msra.mxu0 %v2652_v14  ;;  %v2663_v14 = vld [vmem:[%s3863_s21 + $0x38] sm:$0xff]  }
 0x402   :  { %2382 = vmatprep.subr.bf16.mxu0 %v3269_v3  ;;  %2430 = vmatpush3.bf16.msra.mxu1 %v2663_v14 }
 0x403   :  { %2447 = vmatprep.subr.bf16.mxu1 %v3269_v3 }
 0x405   :  { %2383 = vmatpush3.bf16.msra.mxu0 %v2653_v15  ;;  %v2178_v15 = vld [vmem:[#allocation9] ss:$0 sm:$0xff] }
 0x406   :  { %2384 = vmatprep.subr.bf16.mxu0 %v3269_v3 }
 0x409   :  { %2385 = vmatpush3.bf16.msra.mxu0 %v2654_v16  ;;  %v1259_v16 = vld [vmem:[#allocation12] sm:$0x7] }
 0x40a   :  { %2386 = vmatprep.subr.bf16.mxu0 %v3269_v3  ;;  %v1269_v21 = vrot.slane %v1259_v16, %v3593_v26  ;;  %v1264_v23 = vrot.slane %v1259_v16, %v3596_v27  ;;  %v1275_v34 = vrot.slane %v1259_v16, %v3603_v32  ;;  %v2210_v32 = vld [vmem:[#allocation14] ss:$0 sm:$0xff] }
 0x40c   :  { %v1270_v30 = vmul.f32 %v1269_v21, %v3598_v29  ;;  %v1265_v31 = vmul.f32 %v1264_v23, %v3605_v33  ;;  %v1276_v41 = vmul.f32 %v1275_v34, %v3610_v37  ;;  %v2666_v33 = vld [vmem:[#allocation15 + $0x10] sm:$0xff]   ;;  %v2667_v37 = vld [vmem:[#allocation15 + $0x18] sm:$0xff]  }
 0x40d   :  { %2387 = vmatpush3.bf16.msra.mxu0 %v2655_v17  ;;  %v2675_v34 = vld [vmem:[%s3865_s16 + $0x38] sm:$0xff]  }
 0x40e   :  { %2542 = vmatprep.subr.bf16.mxu0 %v3268_v2  ;;  %v1271_v40 = vadd.f32 %v1270_v30, %v1265_v31  ;;  %v2673_v30 = vld [vmem:[%s3865_s16 + $0x28] sm:$0xff]   ;;  %v2674_v31 = vld [vmem:[%s3865_s16 + $0x30] sm:$0xff]  }
 0x410   :  { %v1277_v29 = vadd.f32 %v1276_v41, %v1271_v40  ;;  %v2680_v40 = vld [vmem:[%s3866_s12 + $0x20] sm:$0xff]   ;;  %v2681_v41 = vld [vmem:[%s3866_s12 + $0x28] sm:$0xff]  }
 0x412   :  { %v1284_v44 = vadd.f32 %v2210_v32, %v1277_v29 }
 0x414   :  { %v1285_v45 = vmax.f32 %v1284_v44, 0.0 }
 0x416   :  { %v1295_v46 = vpack.c.bf16 %v1285_v45, %v1285_v45 }
 0x4c3   :  { %v713_v55 = vpop.f32.mrb[2].mxu0 }
 0x4c4   :  { %v734_v58 = vpack.c.bf16 %v713_v55, %v713_v55  ;;  %v2371_v59 = vpop.f32.mrb[3].mxu0  ;;  %v935_v60 = vpop.f32.mrb[4].mxu1 }
 0x4c5   :  { %v936_v63 = vadd.f32 %v2187_v54, %v935_v60  ;;  %v2410_v1 = vpop.f32.mrb[5].mxu1 }
 0x4c6   :  { %2389 = vmatmul.mubr.bf16.vlgmr.msra.gmra.mrb[4].mxu0 %v734_v58  ;;  %v938_v4 = vpop.f32.mrb[6].mxu1 }
 0x4c7   :  { %1371 = vrot.lane.b32.xlu1 %v936_v63, %s3246_s0  ;;  %v2411_v5 = vpop.f32.mrb[7].mxu1  ;;  %2544 = vmatpush3.bf16.msra.mxu0 %v2543_v56  ;;  %s3864_s0 = sld [smem:[#allocation53_spill]]  ;;  %v2209_v56 = vld [vmem:[#allocation24] ss:$0 sm:$0xff] }
 0x4c8   :  { %2545 = vmatprep.subr.bf16.mxu0 %v3268_v2  ;;  %2420 = vmatprep.mubr.msk.f32.mxu0 %vm3270_vm0, %v3269_v3  ;;  %v2659_v2 = vld [vmem:[%s3863_s21 + $0x10] sm:$0xff]  }
 0x4cb   :  { %2547 = vmatpush3.bf16.msra.mxu0 %v2546_v7 }
 0x4cc   :  { %2435 = vmatprep.subr.bf16.mxu0 %v3269_v3 }
 0x4cd   :  { %v383_v47 = vld [vmem:[%s3864_s0] sm:$0xff] }
 0x4ce   :  { %2421 = vmatmul.mubr.msk.f32.vlgmr.msra.gmra.mrb[8].mxu0 %vm1023_vm6, %v1011_v10  ;;  %vm1447_vm8 = vcmp.eq.s32.totalorder %v383_v47, 0  ;;  %vm1460_vm9 = vcmp.eq.s32.totalorder %v383_v47, 1  ;;  %v2669_v10 = vld [vmem:[%s3865_s16 + $0x8] sm:$0xff]  }
 0x4cf   :  { %2436 = vmatpush3.bf16.msra.mxu0 %v2656_v9  ;;  %2443 = vmatprep.mubr.msk.bf16.mxu0 %vm3270_vm0, %v3269_v3  ;;  %v2218_v48 = vsel %vm1447_vm8, 1.0, %v3269_v3  ;;  %v2219_v49 = vsel %vm1460_vm9, 1.0, %v3269_v3  ;;  %v2668_v9 = vld [vmem:[%s3865_s16] sm:$0xff]  }
 0x4d0   :  { %2437 = vmatprep.subr.bf16.mxu0 %v3269_v3  ;;  %v2627_v50 = vpack.i.bf16 %v2219_v49, %v2218_v48  ;;  %v3770_v49 = vld [vmem:[#allocation32] ss:$0 sm:$0xff] }
 0x4d2   :  { %2628 = vperm.xlu1 %2626, %v2627_v50  }
 0x4d3   :  { %2438 = vmatpush3.bf16.msra.mxu0 %v2657_v0 }
 0x4d4   :  { %2439 = vmatprep.subr.bf16.mxu0 %v3269_v3 }
 0x4d7   :  { %2440 = vmatpush3.bf16.msra.mxu0 %v2659_v2 }
 0x4d8   :  { %2441 = vmatprep.subr.bf16.mxu0 %v3269_v3 }
 0x4db   :  { %2442 = vmatpush3.bf16.msra.mxu0 %v2661_v12 }
 0x4dc   :  { %2459 = vmatprep.subr.mxu0 %v3269_v3 }
 0x539   :  { %v1372_v5 = vpop.permute.xlu1 %1371 }
 0x551   :  { %v2629_v0 = vpop.permute.xlu1 %2628 }
 0x552   :  { %v3723_v2 = vunpack.i.h.bf16 %v2629_v0  ;;  %v3725_v11 = vunpack.i.l.bf16 %v2629_v0 }
 0x599   :  { %v823_v17 = vpop.f32.mrb[4].mxu0 }
 0x59a   :  { %v824_v18 = vadd.f32 %v2178_v15, %v823_v17  ;;  %v2390_v19 = vpop.f32.mrb[5].mxu0 }
 0x59b   :  { %v826_v20 = vpop.f32.mrb[6].mxu0 }
 0x59c   :  { %v1097_v24 = vpack.c.bf16 %v824_v18, %v824_v18  ;;  %v2391_v25 = vpop.f32.mrb[7].mxu0  ;;  %v3731_v18 = vld [vmem:[#allocation33] ss:$0 sm:$0xff] }
 0x59d   :  { %v2671_v25 = vld [vmem:[%s3865_s16 + $0x18] sm:$0xff]  }
 0x59e   :  { %2444 = vmatmul.mubr.msk.bf16.vlgmr.msra.gmra.mrb[12].mxu0 %vm1139_vm7, %v1097_v24  ;;  %v2670_v24 = vld [vmem:[%s3865_s16 + $0x10] sm:$0xff]  }
 0x59f   :  { %2461 = vmatprep.mubr.msk.f32.mxu0 %vm3270_vm0, %v3269_v3 }
 0x5a1   :  { %v1093_v35 = vpop.f32.mrb[8].mxu0 }
 0x5a2   :  { %v1094_v36 = vadd.f32 %v2197_v28, %v1093_v35  ;;  %v2422_v38 = vpop.f32.mrb[9].mxu0  ;;  %v2672_v28 = vld [vmem:[%s3865_s16 + $0x20] sm:$0xff]  }
 0x5a3   :  { %v2676_v35 = vld [vmem:[%s3866_s12] sm:$0xff]   ;;  %v2678_v38 = vld [vmem:[%s3866_s12 + $0x10] sm:$0xff]  }
 0x5a4   :  { %v1106_v42 = vpack.c.bf16 %v1094_v36, %v1094_v36  ;;  %v2677_v36 = vld [vmem:[%s3866_s12 + $0x8] sm:$0xff]  }
 0x5a6   :  { %2432 = vmatmul.mubr.msk.bf16.vlgmr.msra.gmra.mrb[8].mxu1 %vm1139_vm7, %v1106_v42 }
 0x5a7   :  { %2448 = vmatpush3.bf16.msra.mxu1 %v2664_v39  ;;  %2455 = vmatprep.mubr.msk.bf16.mxu1 %vm3270_vm0, %v3269_v3  ;;  %v2679_v39 = vld [vmem:[%s3866_s12 + $0x18] sm:$0xff]  }
 0x5a8   :  { %2449 = vmatprep.subr.bf16.mxu1 %v3269_v3 }
 0x5ab   :  { %2450 = vmatpush3.bf16.msra.mxu1 %v2665_v43 }
 0x5ac   :  { %2451 = vmatprep.subr.bf16.mxu1 %v3269_v3 }
 0x5af   :  { %2452 = vmatpush3.bf16.msra.mxu1 %v2666_v33 }
 0x5b0   :  { %2453 = vmatprep.subr.bf16.mxu1 %v3269_v3 }
 0x5b3   :  { %2454 = vmatpush3.bf16.msra.mxu1 %v2667_v37 }
 0x5b4   :  { %2464 = vmatprep.subr.mxu1 %v3269_v3 }
 0x5b6   :  { %2456 = vmatmul.mubr.msk.bf16.vlgmr.msra.gmra.mrb[12].mxu1 %vm1139_vm7, %v1295_v46  ;;  %v3767_v46 = vld [vmem:[#allocation30] ss:$0 sm:$0xff] }
 0x5b7   :  { %2466 = vmatprep.mubr.msk.f32.mxu1 %vm3270_vm0, %v3269_v3 }
 0x671   :  { %v1244_v51 = vpop.f32.mrb[12].mxu0 }
 0x672   :  { %v2445_v52 = vpop.f32.mrb[13].mxu0 }
 0x673   :  { %v1247_v53 = vpop.f32.mrb[14].mxu0 }
 0x674   :  { %v2446_v54 = vpop.f32.mrb[15].mxu0  ;;  %v2682_v53 = vld [vmem:[%s3866_s12 + $0x30] sm:$0xff]  }
 0x675   :  { %v2683_v54 = vld [vmem:[%s3866_s12 + $0x38] sm:$0xff]  }
 0x679   :  { %v1177_v55 = vpop.f32.mrb[8].mxu1 }
 0x67a   :  { %v1245_v57 = vadd.f32 %v1244_v51, %v1177_v55  ;;  %v2433_v58 = vpop.f32.mrb[9].mxu1  ;;  %v2224_v55 = vld [vmem:[#allocation26] ss:$0 sm:$0xff] }
 0x67b   :  { %v1180_v59 = vpop.f32.mrb[10].mxu1 }
 0x67c   :  { %v1257_v60 = vadd.f32 %v2209_v56, %v1245_v57  ;;  %v2434_v22 = vpop.f32.mrb[11].mxu1 }
 0x67e   :  { %1258 = vst [vmem:[#allocation35] sm:$0x3] %v1257_v60 }
 0x689   :  { %v1363_v62 = vpop.f32.mrb[12].mxu1 }
 0x68a   :  { %v1364_v63 = vadd.f32 %v2211_v61, %v1363_v62  ;;  %v2457_v1 = vpop.f32.mrb[13].mxu1  ;;  %v2233_v62 = vld [vmem:[#allocation27] ss:$0 sm:$0xff] }
 0x68b   :  { %v1366_v4 = vpop.f32.mrb[14].mxu1 }
 0x68c   :  { %1369 = vst.msk [vmem:[#allocation2] sm:$0xff] %vm1139_vm7, %v1364_v63  ;;  %v2458_v7 = vpop.f32.mrb[15].mxu1 }
 0x68d   :  { %1375 = vst.msk [vmem:[#allocation2] sm:$0xff] %vm1374_vm10, %v1372_v5 }
 0x694   :  { %v1376_v8 = vld [vmem:[#allocation2] sm:$0xff] }
 0x695   :  { %2460 = vmatpush3.msra.mxu0 %v1376_v8 }
 0x696   :  { %2462 = vmatmul.mubr.msk.f32.vlgmr.msra.gmra.mrb[10].mxu0 %vm643_vm5, %v3637_v6  ;;  %2469 = vmatprep.subr.bf16.mxu0 %v3269_v3 }
 0x697   :  { %2485 = vmatprep.mubr.msk.bf16.mxu0 %vm3270_vm0, %v3269_v3  ;;  %2470 = vmatpush3.bf16.msra.mxu0 %v2668_v9  ;;  %v2684_v9 = vld [vmem:[%s3867_s18] sm:$0xff]  }
 0x698   :  { %2471 = vmatprep.subr.bf16.mxu0 %v3269_v3 }
 0x69b   :  { %2472 = vmatpush3.bf16.msra.mxu0 %v2669_v10  ;;  %v2685_v10 = vld [vmem:[%s3867_s18 + $0x8] sm:$0xff]  }
 0x69c   :  { %2473 = vmatprep.subr.bf16.mxu0 %v3269_v3 }
 0x69f   :  { %2474 = vmatpush3.bf16.msra.mxu0 %v2670_v24  ;;  %v2687_v24 = vld [vmem:[%s3867_s18 + $0x18] sm:$0xff]  }
 0x6a0   :  { %2475 = vmatprep.subr.bf16.mxu0 %v3269_v3 }
 0x6a3   :  { %2476 = vmatpush3.bf16.msra.mxu0 %v2671_v25  ;;  %v2688_v25 = vld [vmem:[%s3867_s18 + $0x20] sm:$0xff]  }
 0x6a4   :  { %2477 = vmatprep.subr.bf16.mxu0 %v3269_v3 }
 0x6a7   :  { %2478 = vmatpush3.bf16.msra.mxu0 %v2672_v28  ;;  %v2689_v28 = vld [vmem:[%s3867_s18 + $0x28] sm:$0xff]  }
 0x6a8   :  { %2479 = vmatprep.subr.bf16.mxu0 %v3269_v3 }
 0x6ab   :  { %2480 = vmatpush3.bf16.msra.mxu0 %v2673_v30  ;;  %v2691_v30 = vld [vmem:[%s3867_s18 + $0x38] sm:$0xff]  }
 0x6ac   :  { %2481 = vmatprep.subr.bf16.mxu0 %v3269_v3 }
 0x6af   :  { %2482 = vmatpush3.bf16.msra.mxu0 %v2674_v31 }
 0x6b0   :  { %2483 = vmatprep.subr.bf16.mxu0 %v3269_v3 }
 0x6b3   :  { %2484 = vmatpush3.bf16.msra.mxu0 %v2675_v34 }
 0x6b4   :  { %2509 = vmatprep.subr.mxu0 %v3269_v3 }
 0x769   :  { %v1443_v12 = vpop.f32.mrb[10].mxu0 }
 0x76a   :  { %v1458_v13 = vrot.slane %v1443_v12, %v3596_v27  ;;  %v1471_v14 = vrot.slane %v1443_v12, %v3593_v26  ;;  %v2463_v15 = vpop.f32.mrb[11].mxu0 }
 0x76c   :  { %v1459_v16 = vmul.f32 %v3725_v11, %v1458_v13  ;;  %v1472_v17 = vmul.f32 %v3723_v2, %v1471_v14 }
 0x76e   :  { %v1473_v19 = vadd.f32 %v1472_v17, %v1459_v16 }
 0x770   :  { %v1480_v20 = vmul.f32 %v3731_v18, %v1473_v19 }
 0x772   :  { %v1481_v21 = vsub.f32 %v1376_v8, %v1480_v20 }
 0x774   :  { %v1482_v23 = vmul.f32 %v1481_v21, %v1481_v21  ;;  %v1570_v47 = vmul.f32 %v3767_v46, %v1481_v21 }
 0x776   :  { %2465 = vmatpush3.msra.mxu1 %v1482_v23  ;;  %v2686_v23 = vld [vmem:[%s3867_s18 + $0x10] sm:$0xff]  }
 0x777   :  { %2467 = vmatmul.mubr.msk.f32.vlgmr.msra.gmra.mrb[16].mxu1 %vm643_vm5, %v3637_v6  ;;  %2489 = vmatprep.subr.bf16.mxu1 %v3269_v3 }
 0x778   :  { %2505 = vmatprep.mubr.msk.bf16.mxu1 %vm3270_vm0, %v3269_v3  ;;  %2490 = vmatpush3.bf16.msra.mxu1 %v2676_v35 }
 0x779   :  { %2491 = vmatprep.subr.bf16.mxu1 %v3269_v3 }
 0x77c   :  { %2492 = vmatpush3.bf16.msra.mxu1 %v2677_v36 }
 0x77d   :  { %2493 = vmatprep.subr.bf16.mxu1 %v3269_v3 }
 0x780   :  { %2494 = vmatpush3.bf16.msra.mxu1 %v2678_v38 }
 0x781   :  { %2495 = vmatprep.subr.bf16.mxu1 %v3269_v3 }
 0x784   :  { %2496 = vmatpush3.bf16.msra.mxu1 %v2679_v39 }
 0x785   :  { %2497 = vmatprep.subr.bf16.mxu1 %v3269_v3 }
 0x788   :  { %2498 = vmatpush3.bf16.msra.mxu1 %v2680_v40 }
 0x789   :  { %2499 = vmatprep.subr.bf16.mxu1 %v3269_v3 }
 0x78c   :  { %2500 = vmatpush3.bf16.msra.mxu1 %v2681_v41 }
 0x78d   :  { %2501 = vmatprep.subr.bf16.mxu1 %v3269_v3 }
 0x790   :  { %2502 = vmatpush3.bf16.msra.mxu1 %v2682_v53 }
 0x791   :  { %2503 = vmatprep.subr.bf16.mxu1 %v3269_v3 }
 0x794   :  { %2504 = vmatpush3.bf16.msra.mxu1 %v2683_v54 }
 0x795   :  { %2514 = vmatprep.subr.mxu1 %v3269_v3 }
 0x84a   :  { %v1549_v42 = vpop.f32.mrb[16].mxu1 }
 0x84b   :  { %v1556_v43 = vrot.slane %v1549_v42, %v3596_v27  ;;  %v1561_v29 = vrot.slane %v1549_v42, %v3593_v26  ;;  %v2468_v32 = vpop.f32.mrb[17].mxu1 }
 0x84d   :  { %v1557_v33 = vmul.f32 %v3725_v11, %v1556_v43  ;;  %v1562_v44 = vmul.f32 %v3723_v2, %v1561_v29 }
 0x84f   :  { %v1563_v37 = vadd.f32 %v1562_v44, %v1557_v33 }
 0x851   :  { %v1571_v45 = vadd.f32 1e-05, %v1563_v37 }
 0x853   :  { %2694 = vrsqrt.f32 %v1571_v45 }
 0x85d   :  { %v2695_v48 = vpop.eup %2694 }
 0x85e   :  { %v1573_v50 = vmul.f32 %v2695_v48, %v1570_v47 }
 0x860   :  { %v1580_v51 = vadd.f32 %v3770_v49, %v1573_v50 }
 0x862   :  { %v1598_v52 = vpack.c.bf16 %v1580_v51, %v1580_v51 }
 0x864   :  { %2486 = vmatmul.mubr.bf16.vlgmr.msra.gmra.mrb[16].mxu0 %v1598_v52 }
 0x865   :  { %2511 = vmatprep.mubr.msk.f32.mxu0 %vm3270_vm0, %v3269_v3 }
 0x937   :  { %v1687_v56 = vpop.f32.mrb[16].mxu0 }
 0x938   :  { %v1688_v57 = vadd.f32 %v2224_v55, %v1687_v56  ;;  %v2487_v58 = vpop.f32.mrb[17].mxu0 }
 0x939   :  { %v1690_v59 = vpop.f32.mrb[18].mxu0 }
 0x93a   :  { %v1693_v60 = vmax.f32 %v1688_v57, 0.0  ;;  %v2488_v22 = vpop.f32.mrb[19].mxu0 }
 0x93c   :  { %v1711_v61 = vpack.c.bf16 %v1693_v60, %v1693_v60 }
 0x93e   :  { %2506 = vmatmul.mubr.bf16.vlgmr.msra.gmra.mrb[20].mxu1 %v1711_v61 }
 0x93f   :  { %2516 = vmatprep.mubr.msk.f32.mxu1 %vm3270_vm0, %v3269_v3 }
 0xa11   :  { %v1800_v63 = vpop.f32.mrb[20].mxu1 }
 0xa12   :  { %v1801_v1 = vadd.f32 %v2233_v62, %v1800_v63  ;;  %v2507_v4 = vpop.f32.mrb[21].mxu1 }
 0xa13   :  { %v1803_v5 = vpop.f32.mrb[22].mxu1 }
 0xa14   :  { %v1806_v7 = vadd.f32 %v1801_v1, %v1580_v51  ;;  %v2508_v8 = vpop.f32.mrb[23].mxu1 }
 0xa16   :  { %2510 = vmatpush3.msra.mxu0 %v1806_v7 }
 0xa17   :  { %2512 = vmatmul.mubr.msk.f32.vlgmr.msra.gmra.mrb[20].mxu0 %vm643_vm5, %v3637_v6  ;;  %2519 = vmatprep.subr.bf16.mxu0 %v3269_v3 }
 0xa18   :  { %2535 = vmatprep.mubr.msk.bf16.mxu0 %vm3270_vm0, %v3269_v3  ;;  %2520 = vmatpush3.bf16.msra.mxu0 %v2684_v9 }
 0xa19   :  { %2521 = vmatprep.subr.bf16.mxu0 %v3269_v3 }
 0xa1c   :  { %2522 = vmatpush3.bf16.msra.mxu0 %v2685_v10 }
 0xa1d   :  { %2523 = vmatprep.subr.bf16.mxu0 %v3269_v3 }
 0xa20   :  { %2524 = vmatpush3.bf16.msra.mxu0 %v2686_v23 }
 0xa21   :  { %2525 = vmatprep.subr.bf16.mxu0 %v3269_v3 }
 0xa24   :  { %2526 = vmatpush3.bf16.msra.mxu0 %v2687_v24 }
 0xa25   :  { %2527 = vmatprep.subr.bf16.mxu0 %v3269_v3 }
 0xa28   :  { %2528 = vmatpush3.bf16.msra.mxu0 %v2688_v25 }
 0xa29   :  { %2529 = vmatprep.subr.bf16.mxu0 %v3269_v3 }
 0xa2c   :  { %2530 = vmatpush3.bf16.msra.mxu0 %v2689_v28 }
 0xa2d   :  { %2531 = vmatprep.subr.bf16.mxu0 %v3269_v3 }
 0xaea   :  { %v1873_v0 = vpop.f32.mrb[20].mxu0 }
 0xaeb   :  { %v1880_v12 = vrot.slane %v1873_v0, %v3596_v27  ;;  %v1885_v13 = vrot.slane %v1873_v0, %v3593_v26  ;;  %v2513_v14 = vpop.f32.mrb[21].mxu0 }
 0xaed   :  { %v1881_v15 = vmul.f32 %v3725_v11, %v1880_v12  ;;  %v1886_v16 = vmul.f32 %v3723_v2, %v1885_v13 }
 0xaef   :  { %v1887_v17 = vadd.f32 %v1886_v16, %v1881_v15 }
 0xaf1   :  { %v1888_v19 = vmul.f32 %v3731_v18, %v1887_v17  ;;  %v2690_v18 = vld [vmem:[%s3867_s18 + $0x30] sm:$0xff]  }
 0xaf2   :  { %2532 = vmatpush3.bf16.msra.mxu0 %v2690_v18 }
 0xaf3   :  { %v1889_v20 = vsub.f32 %v1806_v7, %v1888_v19  ;;  %2533 = vmatprep.subr.bf16.mxu0 %v3269_v3 }
 0xaf5   :  { %v1890_v21 = vmul.f32 %v1889_v20, %v1889_v20  ;;  %v1972_v41 = vmul.f32 %v3767_v46, %v1889_v20 }
 0xaf6   :  { %2534 = vmatpush3.bf16.msra.mxu0 %v2691_v30 }
 0xaf7   :  { %2515 = vmatpush3.msra.mxu1 %v1890_v21 }
 0xaf8   :  { %2517 = vmatmul.mubr.msk.f32.vlgmr.msra.gmra.mrb[18].mxu1 %vm643_vm5, %v3637_v6 }
 0xbcb   :  { %v1957_v6 = vpop.f32.mrb[18].mxu1 }
 0xbcc   :  { %v1964_v31 = vrot.slane %v1957_v6, %v3596_v27  ;;  %v1969_v34 = vrot.slane %v1957_v6, %v3593_v26  ;;  %v2518_v35 = vpop.f32.mrb[19].mxu1 }
 0xbce   :  { %v1965_v36 = vmul.f32 %v3725_v11, %v1964_v31  ;;  %v1970_v38 = vmul.f32 %v3723_v2, %v1969_v34 }
 0xbd0   :  { %v1971_v39 = vadd.f32 %v1970_v38, %v1965_v36 }
 0xbd2   :  { %v1973_v40 = vadd.f32 1e-05, %v1971_v39 }
 0xbd4   :  { %2696 = vrsqrt.f32 %v1973_v40 }
 0xbde   :  { %v2697_v42 = vpop.eup %2696 }
 0xbdf   :  { %v1975_v43 = vmul.f32 %v2697_v42, %v1972_v41 }
 0xbe1   :  { %v1976_v3 = vadd.f32 %v3770_v49, %v1975_v43 }
 0xbe3   :  { %v1994_v29 = vpack.c.bf16 %v1976_v3, %v1976_v3 }
 0xbe5   :  { %2536 = vmatmul.mubr.bf16.vlgmr.msra.gmra.mrb[24].mxu0 %v1994_v29 }
 0xbe6   :  { %3149 = shalt.err (!%p3146_p10)
}
 0xbe7   :  { %s3150_s6 = scalar_lea.hbm %s3450_s5, 32 }
 0xbe8   :  { %p3151_p11 = scmp.ne.s32.totalorder %s3450_s5, %s3150_s6  ;;  %p3154_p12 = scmp.lt.u32.totalorder %s3150_s6, %s3450_s5 }
 0xbea   :  { %p3156_p13 = pnand %p3154_p12, %p3151_p11 }
 0xbec   :  { %3159 = shalt.err (!%p3156_p13)
}
 0xbed   :  { %2099 = dma.vmem_to_hbm [thread:$0]  %s2097_s22, 32, %s3450_s5, [#allocation5]   ;;  %v2244_v26 = vld [vmem:[#allocation29] ss:$0 sm:$0xff] }
 0xbee   :  { %s3276_s26 = smov [#allocation36]  }
 0xbef   :  { %s2106_s17 = sshll.u32 %s3276_s26, 4  ;;  %s2107_s17 = int_to_ptr.vmem [resolvable:$true] %s2106_s17 }
 0xbf0   :  { %s3160_s27 = scalar_lea.vmem %s2107_s17, 128  ;;  %p3165_p1 = scmp.lt.s32.totalorder %s2107_s17, %s2107_s17 }
 0xbf1   :  { %p3161_p0 = scmp.ne.s32.totalorder %s2107_s17, %s3160_s27  ;;  %p3166_p2 = scmp.lt.s32.totalorder %s3160_s27, %s3160_s27 }
 0xbf3   :  { %p3167_p3 = por %p3166_p2, %p3165_p1 }
 0xbf5   :  { %p3168_p4 = pnand %p3167_p3, %p3161_p0 }
 0xcb8   :  { %v2083_v27 = vpop.f32.mrb[24].mxu0 }
 0xcb9   :  { %v2084_v2 = vadd.f32 %v2244_v26, %v2083_v27  ;;  %v2537_v11 = vpop.f32.mrb[25].mxu0 }
 0xcba   :  { %v2086_v32 = vpop.f32.mrb[26].mxu0 }
 0xcbb   :  { %2089 = vst [vmem:[#allocation36] sm:$0xff] %v2084_v2  ;;  %v2538_v33 = vpop.f32.mrb[27].mxu0 }
 0xcbc   :  { %3171 = shalt.err (!%p3168_p4)
}
 0xcbd   :  { %s3172_s5 = scalar_lea.hbm %s3455_s19, 128 }
 0xcbe   :  { %p3173_p5 = scmp.ne.s32.totalorder %s3455_s19, %s3172_s5  ;;  %p3176_p6 = scmp.lt.u32.totalorder %s3172_s5, %s3455_s19 }
 0xcc0   :  { %p3178_p7 = pnand %p3176_p6, %p3173_p5 }
 0xcc2   :  { %3181 = shalt.err (!%p3178_p7)
}
 0xcc3   :  { %2109 = dma.vmem_to_hbm [thread:$0]  %s2107_s17, 128, %s3455_s19, [#allocation37]  }
 0xcc4   :  { %3204 = dma.done.wait [#allocation5], 32  }
 0xcc5   :  { %3205 = vsyncadd [#allocation5], 4294967264 }
 0xcc6   :  { %3206 = dma.done.wait [#allocation37], 128  }
 0xcc7   :  { %3207 = vsyncadd [#allocation37], 4294967168 }
 0xcc8   :  { %2116 = vsyncpa [#allocation4], 1 }
 0xcc9   :  { %2117 = vsyncpa [#allocation7], 1 }
 0xcca   :  { %2118 = vsyncpa [#allocation10], 1 }
 0xccb   :  { %2119 = vsyncpa [#allocation13], 1 }
 0xccc   :  { %2120 = vsyncpa [#allocation16], 1 }
 0xccd   :  { %2121 = vsyncpa [#allocation19], 1 }
 0xcce   :  { %2122 = vsyncpa [#allocation22], 1 }
 0xccf   :  { %2123 = vsyncpa [#allocation25], 1 }
 0xcd0   :  { %2124 = vsyncpa [#allocation28], 1 }
 0xcd1   :  { %2125 = vsyncpa [#allocation31], 1 }
 0xcd2   :  { %2126 = vsyncpa [#allocation34], 1 }
 0xcd3   :  { %2127 = vsyncpa [#allocation5], 1 }
 0xcd4   :  { %2128 = vsyncpa [#allocation37], 1 }

</bundles_post_ra>
